<compile_context>
chip_gen: v6e
topology: v6e:2x2x1
jax: 0.10.0
libtpu: 0.0.40
codegen_flags: <defaults>
</compile_context>

<pallas_src>
import numpy as np
import jax
import jax.numpy as jnp
from jax.experimental import pallas as pl
from jax.experimental.pallas import tpu as pltpu

_LANE = 128
_SUBLANE = 8


def _round_up(x, m):
    return (x + m - 1) // m * m


# ---------------------------------------------------------------------------
# Component "classes" (stand-in for my_import) with deterministic init
# ---------------------------------------------------------------------------
class ConvBlock:
    """Conv2d + optional LeakyReLU(0.01); parameters drawn deterministically."""

    def __init__(self, key, in_channels, out_channels, kernel_size,
                 padding=0, activation=True):
        kw_key, kb_key = jax.random.split(key)
        fan_in = in_channels * kernel_size * kernel_size
        scale = 1.0 / jnp.sqrt(jnp.float32(fan_in))
        self.weight = (jax.random.normal(
            kw_key, (out_channels, in_channels, kernel_size, kernel_size),
            jnp.float32) * scale)
        self.bias = jax.random.normal(kb_key, (out_channels,), jnp.float32) * scale
        self.padding = padding
        self.negative_slope = 0.01 if activation else None

    def __call__(self, x):                       # standalone (un-fused) path
        return _ref_conv(x, self.weight, self.bias, self.padding,
                         self.negative_slope)


class ConcatMerge:
    """Concatenates x with the forward_in tensor(s) along the channel dim."""

    def __init__(self, key):
        del key

    def __call__(self, x, forward_in):
        return jnp.concatenate(
            [x] + [forward_in[k] for k in sorted(forward_in.keys())], axis=1)


_COMPONENT_REGISTRY = {"ConvBlock": ConvBlock, "ConcatMerge": ConcatMerge}


def my_import(name):
    return _COMPONENT_REGISTRY[name]


# ---------------------------------------------------------------------------
# Generic graph walker (mirrors ModelBuilder.forward control flow)
# ---------------------------------------------------------------------------
def _walk_graph(mb, x, apply_fn):
    data = {}
    for i, module in enumerate(mb.self_modules):
        if i not in mb.sequences:
            x = apply_fn(module, x, None)
        else:
            op = mb.sequences[i]
            fwd = None
            if "forward_in" in op:
                fwd = {k: data[v] for k, v in op["forward_in"].items()}
            x = apply_fn(module, x, fwd)
            if "store_out" in op:
                data[op["store_out"]] = x
    return x


# ---------------------------------------------------------------------------
# Static planning pass: channel-count propagation (no tracing, no eval_shape)
# ---------------------------------------------------------------------------
def _plan_graph(builder, in_true_c, in_kern_c):
    """Walks the graph on (true_channels, kernel_channels) piece descriptors.

    Returns {id(ConvBlock): plan}, the ConvBlocks in consumption order, and the
    output piece structure.  `kernel_channels >= true_channels` where the value
    seen inside the kernel carries zero-padded channels (the network input)."""
    plans = {}
    order = []

    def apply_fn(module, pieces, fwd):
        if isinstance(module, ModelBuilder):
            return _walk_graph(module, pieces, apply_fn)
        if isinstance(module, ConvBlock):
            c_out, c_in, kh, kw = module.weight.shape
            true_total = sum(tc for tc, _ in pieces)
            kern_total = sum(kc for _, kc in pieces)
            assert true_total == c_in, (true_total, c_in)
            plans[id(module)] = {"pieces_in": tuple(pieces),
                                 "kin": kh * kw * kern_total}
            order.append(module)
            return [(c_out, c_out)]
        if isinstance(module, ConcatMerge):
            out = list(pieces)
            for k in sorted(fwd.keys()):
                out = out + list(fwd[k])
            return out
        raise TypeError(f"unsupported module type {type(module)}")

    out_pieces = _walk_graph(builder, [(in_true_c, in_kern_c)], apply_fn)
    return plans, order, out_pieces


# ---------------------------------------------------------------------------
# Host-side helpers: border masks and parameter slab packing
# ---------------------------------------------------------------------------
def _build_masks(k, pad, H, W, n_valid, n_total):
    """(k*k, n_total) f32 {0,1} tap-validity masks for the batch-folded layout."""
    r = (k - 1) // 2
    assert pad == r, (k, pad)
    HW = H * W
    p = np.arange(n_total)
    h = (p % HW) // W
    w = p % W
    in_img = p < n_valid
    rows = []
    for dy in range(-r, r + 1):
        for dx in range(-r, r + 1):
            ok = ((h + dy >= 0) & (h + dy < H) &
                  (w + dx >= 0) & (w + dx < W) & in_img)
            rows.append(ok.astype(np.float32))
    return np.stack(rows, axis=0)


def _pack_weight_bias(block, pieces_in):
    """(Cout,Cin,kh,kw) + bias -> (Cout, kh*kw*kern_cin + 1) with zero columns
    wherever a consumed piece carries zero-padded channels (kern > true)."""
    w = block.weight
    c_out, c_in, kh, kw = w.shape
    wt = jnp.transpose(w, (0, 2, 3, 1))                       # (Cout,kh,kw,Cin)
    cols = []
    off = 0
    for (tc, kc) in pieces_in:
        pw = wt[..., off:off + tc]
        if kc > tc:
            pw = jnp.concatenate(
                [pw, jnp.zeros((c_out, kh, kw, kc - tc), w.dtype)], axis=-1)
        cols.append(pw)
        off += tc
    assert off == c_in
    wk = cols[0] if len(cols) == 1 else jnp.concatenate(cols, axis=-1)
    kern_c = sum(kc for _, kc in pieces_in)
    w2 = wk.reshape(c_out, kh * kw * kern_c)
    b2 = block.bias.reshape(c_out, 1)
    return jnp.concatenate([w2, b2], axis=1)


# ---------------------------------------------------------------------------
# Fused kernel (whole graph in VMEM, single invocation)
# ---------------------------------------------------------------------------
def _make_fused_kernel(builder, plans, mask_offsets, H, W, out_piece_plan):

    def kernel(x_ref, masks_ref, slab_ref, o_ref):
        nhw = x_ref.shape[1]
        masks = masks_ref[...]          # (T, nhw)  static {0,1}
        slab = slab_ref[...]            # (rows, 128) packed [w | b] per block

        def conv_apply(block, pieces):
            plan = plans[id(block)]
            c_out, _, kh, kw = block.weight.shape
            r0, kin = plan["row"], plan["kin"]
            wb = slab[r0:r0 + c_out, :kin + 1]
            w = wb[:, :kin]
            b = wb[:, kin:kin + 1]
            if kh == 1 and kw == 1 and block.padding == 0:
                # 1x1 conv: per-piece matmuls accumulated -> no concat ever
                # materializes (ConcatMerge elimination).
                y = None
                col = 0
                for piece, (_, kc) in zip(pieces, plan["pieces_in"]):
                    term = jnp.dot(w[:, col:col + kc], piece,
                                   preferred_element_type=jnp.float32)
                    y = term if y is None else y + term
                    col += kc
                y = y + b
            else:
                # TODO(synk): only stride-1, odd-kernel, 'same'-padding convs
                # are fused; other configs are not implemented.
                assert kh == kw and block.padding == (kh - 1) // 2, \
                    (kh, kw, block.padding)
                x = pieces[0] if len(pieces) == 1 else \
                    jnp.concatenate(pieces, axis=0)
                m0 = mask_offsets[(kh, block.padding)]
                r = (kh - 1) // 2
                taps = []
                t = 0
                for dy in range(-r, r + 1):
                    for dx in range(-r, r + 1):
                        s = dy * W + dx
                        rolled = x if s == 0 else \
                            pltpu.roll(x, shift=(-s) % nhw, axis=1)
                        taps.append(rolled * masks[m0 + t:m0 + t + 1, :])
                        t += 1
                stacked = jnp.concatenate(taps, axis=0)       # (kin, nhw)
                y = jnp.dot(w, stacked,
                            preferred_element_type=jnp.float32) + b
            if block.negative_slope is not None:
                y = jnp.where(y > 0.0, y, block.negative_slope * y)
            return [y]

        def apply_fn(module, pieces, fwd):
            if isinstance(module, ModelBuilder):
                return _walk_graph(module, pieces, apply_fn)
            if isinstance(module, ConvBlock):
                return conv_apply(module, pieces)
            if isinstance(module, ConcatMerge):
                out = list(pieces)
                for k in sorted(fwd.keys()):
                    out = out + list(fwd[k])
                return out
            raise TypeError(f"unsupported module type {type(module)}")

        out_pieces = _walk_graph(builder, [x_ref[...]], apply_fn)
        trimmed = []
        for val, (tc, kc) in zip(out_pieces, out_piece_plan):
            trimmed.append(val if tc == kc else val[:tc, :])
        y = trimmed[0] if len(trimmed) == 1 else \
            jnp.concatenate(trimmed, axis=0)
        o_ref[...] = y.astype(o_ref.dtype)

    return kernel


# ---------------------------------------------------------------------------
# ModelBuilder — same construction / forward semantics as the torch module,
# forward runs as a single fused Pallas kernel.
# ---------------------------------------------------------------------------
class ModelBuilder:
    def __init__(self, tag, children, key):
        self.tag = tag
        self.child_modules = children
        self.data = {}
        self.self_modules = []
        self.sequences = {}
        self._key = key
        self.__construct__()

    def _next_key(self):
        self._key, sub = jax.random.split(self._key)
        return sub

    def __construct__(self):
        for child in self.child_modules:
            if "Tag" in child.keys():
                self.self_modules.append(
                    ModelBuilder(child["Tag"], child["Children"],
                                 self._next_key()))
            elif "store_out" not in child.keys() and "forward_in" not in child.keys():
                module = my_import(child["ComponentClass"])
                self.self_modules.append(module(self._next_key(), **child["args"]))
            else:
                this_operation = {}
                self.self_modules.append(
                    my_import(child["ComponentClass"])(self._next_key(),
                                                       **child["args"]))
                if "store_out" in child.keys():
                    this_operation["store_out"] = child["store_out"]
                if "forward_in" in child.keys():
                    if not isinstance(child["forward_in"], dict):
                        child["forward_in"] = {child["forward_in"]: child["forward_in"]}
                    this_operation["forward_in"] = child["forward_in"]
                self.sequences[len(self.self_modules) - 1] = this_operation

    def __call__(self, x):
        return self.forward(x)

    def forward(self, x):
        N, C, H, W = x.shape
        HW = H * W
        NHW = N * HW
        NHW_pad = _round_up(NHW, _LANE)          # lane-dense output stores
        C_pad = _round_up(C, _SUBLANE)           # sublane-aligned tap stack

        # Static channel plan (replaces jax.eval_shape of the reference).
        plans, blocks, out_piece_plan = _plan_graph(self, C, C_pad)
        c_out = sum(tc for tc, _ in out_piece_plan)

        # Pack every weight+bias into ONE lane-dense f32 slab (single DMA).
        wb_list = []
        row = 0
        for blk in blocks:
            plan = plans[id(blk)]
            wb = _pack_weight_bias(blk, plan["pieces_in"])
            plan["row"] = row
            row += wb.shape[0]
            wb_list.append(wb)
        slab_rows = _round_up(max(row, _SUBLANE), _SUBLANE)
        slab_cols = _round_up(max([wb.shape[1] for wb in wb_list] + [1]), _LANE)
        slab = jnp.zeros((slab_rows, slab_cols), jnp.float32)
        r = 0
        for wb in wb_list:
            slab = slab.at[r:r + wb.shape[0], :wb.shape[1]].set(wb)
            r += wb.shape[0]

        # Precompute static border-validity masks once per spatial-kernel config.
        mask_offsets = {}
        mask_rows = []
        for blk in blocks:
            kh, kw = blk.weight.shape[2], blk.weight.shape[3]
            if kh == 1 and kw == 1 and blk.padding == 0:
                continue
            key_k = (kh, blk.padding)
            if key_k in mask_offsets:
                continue
            mask_offsets[key_k] = sum(m.shape[0] for m in mask_rows)
            mask_rows.append(_build_masks(kh, blk.padding, H, W, NHW, NHW_pad))
        if mask_rows:
            masks = jnp.asarray(np.concatenate(mask_rows, axis=0))
        else:
            masks = jnp.zeros((1, NHW_pad), jnp.float32)

        # Input in (C_pad, N*H*W) layout: channels on sublanes, the full batch's
        # spatial positions folded onto the lane axis (512 lanes for this case).
        xk = jnp.transpose(x, (1, 0, 2, 3)).reshape(C, NHW).astype(jnp.float32)
        if C_pad > C or NHW_pad > NHW:
            xk = jnp.pad(xk, ((0, C_pad - C), (0, NHW_pad - NHW)))

        kernel = _make_fused_kernel(self, plans, mask_offsets, H, W,
                                    out_piece_plan)
        # No grid: one invocation, all operands fully VMEM-resident (<100 KiB).
        y = pl.pallas_call(
            kernel,
            out_shape=jax.ShapeDtypeStruct((c_out, NHW_pad), jnp.float32),
        )(xk, masks, slab)

        y = y[:, :NHW].reshape(c_out, N, H, W)
        return jnp.transpose(y, (1, 0, 2, 3))


# ---------------------------------------------------------------------------
# Pure-JAX reference (lax.conv) to check the fused Pallas path
# ---------------------------------------------------------------------------
def _ref_conv(x, w, b, padding, negative_slope):
    y = jax.lax.conv_general_dilated(
        x, w, window_strides=(1, 1),
        padding=[(padding, padding), (padding, padding)],
        dimension_numbers=("NCHW", "OIHW", "NCHW"))
    y = y + b.reshape(1, -1, 1, 1)
    if negative_slope is not None:
        y = jnp.where(y > 0, y, negative_slope * y)
    return y


def _ref_forward(builder, x):
    def apply_fn(module, x, fwd):
        if isinstance(module, ModelBuilder):
            return _walk_graph(module, x, apply_fn)
        if isinstance(module, ConvBlock):
            return _ref_conv(x, module.weight, module.bias, module.padding,
                             module.negative_slope)
        if isinstance(module, ConcatMerge):
            return jnp.concatenate(
                [x] + [fwd[k] for k in sorted(fwd.keys())], axis=1)
        raise TypeError(type(module))

    return _walk_graph(builder, x, apply_fn)


if __name__ == "__main__":
    children = [
        {"ComponentClass": "ConvBlock",
         "args": {"in_channels": 4, "out_channels": 8, "kernel_size": 3,
                  "padding": 1},
         "store_out": "skip0"},
        {"Tag": "inner_block",
         "Children": [
             {"ComponentClass": "ConvBlock",
              "args": {"in_channels": 8, "out_channels": 8, "kernel_size": 3,
                       "padding": 1}},
         ]},
        {"ComponentClass": "ConvBlock",
         "args": {"in_channels": 8, "out_channels": 8, "kernel_size": 3,
                  "padding": 1}},
        {"ComponentClass": "ConcatMerge", "args": {}, "forward_in": "skip0"},
        {"ComponentClass": "ConvBlock",
         "args": {"in_channels": 16, "out_channels": 4, "kernel_size": 1,
                  "padding": 0, "activation": False}},
    ]

    model = ModelBuilder("root", children, key=jax.random.PRNGKey(42))

    x = jax.random.normal(jax.random.PRNGKey(0), (2, 4, 16, 16), jnp.float32)

    out = jax.block_until_ready(model(x))
    assert out.shape == (2, 4, 16, 16), out.shape

    ref = jax.block_until_ready(_ref_forward(model, x))
    assert jnp.allclose(out, ref, atol=1e-4, rtol=1e-4), \
        float(jnp.max(jnp.abs(out - ref)))

    print("KERNEL_OK")
</pallas_src>

<mosaic_0001>
module attributes {stable_mosaic.version = 11 : i64} {
  func.func @kernel(%arg0: memref<8x512xf32, #tpu.memory_space<vmem>>, %arg1: memref<9x512xf32, #tpu.memory_space<vmem>>, %arg2: memref<32x128xf32, #tpu.memory_space<vmem>>, %arg3: memref<4x512xf32, #tpu.memory_space<vmem>>) attributes {dimension_semantics = [], scalar_prefetch = 0 : i64, scratch_operands = 0 : i64, tpu.core_type = #tpu.core_type<tc>} {
    %c0 = arith.constant 0 : index
    %c0_0 = arith.constant 0 : index
    %0 = vector.load %arg1[%c0, %c0_0] : memref<9x512xf32, #tpu.memory_space<vmem>>, vector<9x512xf32>
    %c0_1 = arith.constant 0 : index
    %c0_2 = arith.constant 0 : index
    %1 = vector.load %arg2[%c0_1, %c0_2] : memref<32x128xf32, #tpu.memory_space<vmem>>, vector<32x128xf32>
    %c0_3 = arith.constant 0 : index
    %c0_4 = arith.constant 0 : index
    %2 = vector.load %arg0[%c0_3, %c0_4] : memref<8x512xf32, #tpu.memory_space<vmem>>, vector<8x512xf32>
    %3 = vector.extract_strided_slice %1 {offsets = [0, 0], sizes = [8, 73], strides = [1, 1]} : vector<32x128xf32> to vector<8x73xf32>
    %4 = vector.extract_strided_slice %3 {offsets = [0, 0], sizes = [8, 72], strides = [1, 1]} : vector<8x73xf32> to vector<8x72xf32>
    %5 = vector.extract_strided_slice %3 {offsets = [0, 72], sizes = [8, 1], strides = [1, 1]} : vector<8x73xf32> to vector<8x1xf32>
    %c17_i32 = arith.constant 17 : i32
    %6 = tpu.dynamic_rotate %2 by %c17_i32 dim 1 : vector<8x512xf32>, i32 -> vector<8x512xf32>
    %7 = vector.extract_strided_slice %0 {offsets = [0, 0], sizes = [1, 512], strides = [1, 1]} : vector<9x512xf32> to vector<1x512xf32>
    %8 = vector.broadcast %7 : vector<1x512xf32> to vector<8x512xf32>
    %9 = arith.mulf %6, %8 : vector<8x512xf32>
    %c16_i32 = arith.constant 16 : i32
    %10 = tpu.dynamic_rotate %2 by %c16_i32 dim 1 : vector<8x512xf32>, i32 -> vector<8x512xf32>
    %11 = vector.extract_strided_slice %0 {offsets = [1, 0], sizes = [1, 512], strides = [1, 1]} : vector<9x512xf32> to vector<1x512xf32>
    %12 = vector.broadcast %11 : vector<1x512xf32> to vector<8x512xf32>
    %13 = arith.mulf %10, %12 : vector<8x512xf32>
    %c15_i32 = arith.constant 15 : i32
    %14 = tpu.dynamic_rotate %2 by %c15_i32 dim 1 : vector<8x512xf32>, i32 -> vector<8x512xf32>
    %15 = vector.extract_strided_slice %0 {offsets = [2, 0], sizes = [1, 512], strides = [1, 1]} : vector<9x512xf32> to vector<1x512xf32>
    %16 = vector.broadcast %15 : vector<1x512xf32> to vector<8x512xf32>
    %17 = arith.mulf %14, %16 : vector<8x512xf32>
    %c1_i32 = arith.constant 1 : i32
    %18 = tpu.dynamic_rotate %2 by %c1_i32 dim 1 : vector<8x512xf32>, i32 -> vector<8x512xf32>
    %19 = vector.extract_strided_slice %0 {offsets = [3, 0], sizes = [1, 512], strides = [1, 1]} : vector<9x512xf32> to vector<1x512xf32>
    %20 = vector.broadcast %19 : vector<1x512xf32> to vector<8x512xf32>
    %21 = arith.mulf %18, %20 : vector<8x512xf32>
    %22 = vector.extract_strided_slice %0 {offsets = [4, 0], sizes = [1, 512], strides = [1, 1]} : vector<9x512xf32> to vector<1x512xf32>
    %23 = vector.broadcast %22 : vector<1x512xf32> to vector<8x512xf32>
    %24 = arith.mulf %2, %23 : vector<8x512xf32>
    %c511_i32 = arith.constant 511 : i32
    %25 = tpu.dynamic_rotate %2 by %c511_i32 dim 1 : vector<8x512xf32>, i32 -> vector<8x512xf32>
    %26 = vector.extract_strided_slice %0 {offsets = [5, 0], sizes = [1, 512], strides = [1, 1]} : vector<9x512xf32> to vector<1x512xf32>
    %27 = vector.broadcast %26 : vector<1x512xf32> to vector<8x512xf32>
    %28 = arith.mulf %25, %27 : vector<8x512xf32>
    %c497_i32 = arith.constant 497 : i32
    %29 = tpu.dynamic_rotate %2 by %c497_i32 dim 1 : vector<8x512xf32>, i32 -> vector<8x512xf32>
    %30 = vector.extract_strided_slice %0 {offsets = [6, 0], sizes = [1, 512], strides = [1, 1]} : vector<9x512xf32> to vector<1x512xf32>
    %31 = vector.broadcast %30 : vector<1x512xf32> to vector<8x512xf32>
    %32 = arith.mulf %29, %31 : vector<8x512xf32>
    %c496_i32 = arith.constant 496 : i32
    %33 = tpu.dynamic_rotate %2 by %c496_i32 dim 1 : vector<8x512xf32>, i32 -> vector<8x512xf32>
    %34 = vector.extract_strided_slice %0 {offsets = [7, 0], sizes = [1, 512], strides = [1, 1]} : vector<9x512xf32> to vector<1x512xf32>
    %35 = vector.broadcast %34 : vector<1x512xf32> to vector<8x512xf32>
    %36 = arith.mulf %33, %35 : vector<8x512xf32>
    %c495_i32 = arith.constant 495 : i32
    %37 = tpu.dynamic_rotate %2 by %c495_i32 dim 1 : vector<8x512xf32>, i32 -> vector<8x512xf32>
    %38 = vector.extract_strided_slice %0 {offsets = [8, 0], sizes = [1, 512], strides = [1, 1]} : vector<9x512xf32> to vector<1x512xf32>
    %39 = vector.broadcast %38 : vector<1x512xf32> to vector<8x512xf32>
    %40 = arith.mulf %37, %39 : vector<8x512xf32>
    %41 = tpu.concatenate %9, %13, %17, %21, %24, %28, %32, %36, %40 in 0 : vector<8x512xf32>, vector<8x512xf32>, vector<8x512xf32>, vector<8x512xf32>, vector<8x512xf32>, vector<8x512xf32>, vector<8x512xf32>, vector<8x512xf32>, vector<8x512xf32> -> vector<72x512xf32>
    %cst = arith.constant dense<0.000000e+00> : vector<8x512xf32>
    %42 = tpu.matmul %4, %41, %cst {dimension_numbers = #tpu.dot_dimension_numbers<[1], [0], [0], [1], [0, 0, 1, 1], [], []>} : vector<8x72xf32>, vector<72x512xf32>, vector<8x512xf32> -> vector<8x512xf32>
    %43 = vector.broadcast %5 : vector<8x1xf32> to vector<8x512xf32>
    %44 = arith.addf %42, %43 : vector<8x512xf32>
    %cst_5 = arith.constant 0.000000e+00 : f32
    %45 = vector.broadcast %cst_5 : f32 to vector<8x512xf32>
    %46 = arith.cmpf ogt, %44, %45 : vector<8x512xf32>
    %cst_6 = arith.constant 0.00999999977 : f32
    %47 = vector.broadcast %cst_6 : f32 to vector<8x512xf32>
    %48 = arith.mulf %47, %44 : vector<8x512xf32>
    %49 = arith.select %46, %44, %48 : vector<8x512xi1>, vector<8x512xf32>
    %50 = vector.extract_strided_slice %1 {offsets = [8, 0], sizes = [8, 73], strides = [1, 1]} : vector<32x128xf32> to vector<8x73xf32>
    %51 = vector.extract_strided_slice %50 {offsets = [0, 0], sizes = [8, 72], strides = [1, 1]} : vector<8x73xf32> to vector<8x72xf32>
    %52 = vector.extract_strided_slice %50 {offsets = [0, 72], sizes = [8, 1], strides = [1, 1]} : vector<8x73xf32> to vector<8x1xf32>
    %c17_i32_7 = arith.constant 17 : i32
    %53 = tpu.dynamic_rotate %49 by %c17_i32_7 dim 1 : vector<8x512xf32>, i32 -> vector<8x512xf32>
    %54 = vector.extract_strided_slice %0 {offsets = [0, 0], sizes = [1, 512], strides = [1, 1]} : vector<9x512xf32> to vector<1x512xf32>
    %55 = vector.broadcast %54 : vector<1x512xf32> to vector<8x512xf32>
    %56 = arith.mulf %53, %55 : vector<8x512xf32>
    %c16_i32_8 = arith.constant 16 : i32
    %57 = tpu.dynamic_rotate %49 by %c16_i32_8 dim 1 : vector<8x512xf32>, i32 -> vector<8x512xf32>
    %58 = vector.extract_strided_slice %0 {offsets = [1, 0], sizes = [1, 512], strides = [1, 1]} : vector<9x512xf32> to vector<1x512xf32>
    %59 = vector.broadcast %58 : vector<1x512xf32> to vector<8x512xf32>
    %60 = arith.mulf %57, %59 : vector<8x512xf32>
    %c15_i32_9 = arith.constant 15 : i32
    %61 = tpu.dynamic_rotate %49 by %c15_i32_9 dim 1 : vector<8x512xf32>, i32 -> vector<8x512xf32>
    %62 = vector.extract_strided_slice %0 {offsets = [2, 0], sizes = [1, 512], strides = [1, 1]} : vector<9x512xf32> to vector<1x512xf32>
    %63 = vector.broadcast %62 : vector<1x512xf32> to vector<8x512xf32>
    %64 = arith.mulf %61, %63 : vector<8x512xf32>
    %c1_i32_10 = arith.constant 1 : i32
    %65 = tpu.dynamic_rotate %49 by %c1_i32_10 dim 1 : vector<8x512xf32>, i32 -> vector<8x512xf32>
    %66 = vector.extract_strided_slice %0 {offsets = [3, 0], sizes = [1, 512], strides = [1, 1]} : vector<9x512xf32> to vector<1x512xf32>
    %67 = vector.broadcast %66 : vector<1x512xf32> to vector<8x512xf32>
    %68 = arith.mulf %65, %67 : vector<8x512xf32>
    %69 = vector.extract_strided_slice %0 {offsets = [4, 0], sizes = [1, 512], strides = [1, 1]} : vector<9x512xf32> to vector<1x512xf32>
    %70 = vector.broadcast %69 : vector<1x512xf32> to vector<8x512xf32>
    %71 = arith.mulf %49, %70 : vector<8x512xf32>
    %c511_i32_11 = arith.constant 511 : i32
    %72 = tpu.dynamic_rotate %49 by %c511_i32_11 dim 1 : vector<8x512xf32>, i32 -> vector<8x512xf32>
    %73 = vector.extract_strided_slice %0 {offsets = [5, 0], sizes = [1, 512], strides = [1, 1]} : vector<9x512xf32> to vector<1x512xf32>
    %74 = vector.broadcast %73 : vector<1x512xf32> to vector<8x512xf32>
    %75 = arith.mulf %72, %74 : vector<8x512xf32>
    %c497_i32_12 = arith.constant 497 : i32
    %76 = tpu.dynamic_rotate %49 by %c497_i32_12 dim 1 : vector<8x512xf32>, i32 -> vector<8x512xf32>
    %77 = vector.extract_strided_slice %0 {offsets = [6, 0], sizes = [1, 512], strides = [1, 1]} : vector<9x512xf32> to vector<1x512xf32>
    %78 = vector.broadcast %77 : vector<1x512xf32> to vector<8x512xf32>
    %79 = arith.mulf %76, %78 : vector<8x512xf32>
    %c496_i32_13 = arith.constant 496 : i32
    %80 = tpu.dynamic_rotate %49 by %c496_i32_13 dim 1 : vector<8x512xf32>, i32 -> vector<8x512xf32>
    %81 = vector.extract_strided_slice %0 {offsets = [7, 0], sizes = [1, 512], strides = [1, 1]} : vector<9x512xf32> to vector<1x512xf32>
    %82 = vector.broadcast %81 : vector<1x512xf32> to vector<8x512xf32>
    %83 = arith.mulf %80, %82 : vector<8x512xf32>
    %c495_i32_14 = arith.constant 495 : i32
    %84 = tpu.dynamic_rotate %49 by %c495_i32_14 dim 1 : vector<8x512xf32>, i32 -> vector<8x512xf32>
    %85 = vector.extract_strided_slice %0 {offsets = [8, 0], sizes = [1, 512], strides = [1, 1]} : vector<9x512xf32> to vector<1x512xf32>
    %86 = vector.broadcast %85 : vector<1x512xf32> to vector<8x512xf32>
    %87 = arith.mulf %84, %86 : vector<8x512xf32>
    %88 = tpu.concatenate %56, %60, %64, %68, %71, %75, %79, %83, %87 in 0 : vector<8x512xf32>, vector<8x512xf32>, vector<8x512xf32>, vector<8x512xf32>, vector<8x512xf32>, vector<8x512xf32>, vector<8x512xf32>, vector<8x512xf32>, vector<8x512xf32> -> vector<72x512xf32>
    %cst_15 = arith.constant dense<0.000000e+00> : vector<8x512xf32>
    %89 = tpu.matmul %51, %88, %cst_15 {dimension_numbers = #tpu.dot_dimension_numbers<[1], [0], [0], [1], [0, 0, 1, 1], [], []>} : vector<8x72xf32>, vector<72x512xf32>, vector<8x512xf32> -> vector<8x512xf32>
    %90 = vector.broadcast %52 : vector<8x1xf32> to vector<8x512xf32>
    %91 = arith.addf %89, %90 : vector<8x512xf32>
    %cst_16 = arith.constant 0.000000e+00 : f32
    %92 = vector.broadcast %cst_16 : f32 to vector<8x512xf32>
    %93 = arith.cmpf ogt, %91, %92 : vector<8x512xf32>
    %cst_17 = arith.constant 0.00999999977 : f32
    %94 = vector.broadcast %cst_17 : f32 to vector<8x512xf32>
    %95 = arith.mulf %94, %91 : vector<8x512xf32>
    %96 = arith.select %93, %91, %95 : vector<8x512xi1>, vector<8x512xf32>
    %97 = vector.extract_strided_slice %1 {offsets = [16, 0], sizes = [8, 73], strides = [1, 1]} : vector<32x128xf32> to vector<8x73xf32>
    %98 = vector.extract_strided_slice %97 {offsets = [0, 0], sizes = [8, 72], strides = [1, 1]} : vector<8x73xf32> to vector<8x72xf32>
    %99 = vector.extract_strided_slice %97 {offsets = [0, 72], sizes = [8, 1], strides = [1, 1]} : vector<8x73xf32> to vector<8x1xf32>
    %c17_i32_18 = arith.constant 17 : i32
    %100 = tpu.dynamic_rotate %96 by %c17_i32_18 dim 1 : vector<8x512xf32>, i32 -> vector<8x512xf32>
    %101 = vector.extract_strided_slice %0 {offsets = [0, 0], sizes = [1, 512], strides = [1, 1]} : vector<9x512xf32> to vector<1x512xf32>
    %102 = vector.broadcast %101 : vector<1x512xf32> to vector<8x512xf32>
    %103 = arith.mulf %100, %102 : vector<8x512xf32>
    %c16_i32_19 = arith.constant 16 : i32
    %104 = tpu.dynamic_rotate %96 by %c16_i32_19 dim 1 : vector<8x512xf32>, i32 -> vector<8x512xf32>
    %105 = vector.extract_strided_slice %0 {offsets = [1, 0], sizes = [1, 512], strides = [1, 1]} : vector<9x512xf32> to vector<1x512xf32>
    %106 = vector.broadcast %105 : vector<1x512xf32> to vector<8x512xf32>
    %107 = arith.mulf %104, %106 : vector<8x512xf32>
    %c15_i32_20 = arith.constant 15 : i32
    %108 = tpu.dynamic_rotate %96 by %c15_i32_20 dim 1 : vector<8x512xf32>, i32 -> vector<8x512xf32>
    %109 = vector.extract_strided_slice %0 {offsets = [2, 0], sizes = [1, 512], strides = [1, 1]} : vector<9x512xf32> to vector<1x512xf32>
    %110 = vector.broadcast %109 : vector<1x512xf32> to vector<8x512xf32>
    %111 = arith.mulf %108, %110 : vector<8x512xf32>
    %c1_i32_21 = arith.constant 1 : i32
    %112 = tpu.dynamic_rotate %96 by %c1_i32_21 dim 1 : vector<8x512xf32>, i32 -> vector<8x512xf32>
    %113 = vector.extract_strided_slice %0 {offsets = [3, 0], sizes = [1, 512], strides = [1, 1]} : vector<9x512xf32> to vector<1x512xf32>
    %114 = vector.broadcast %113 : vector<1x512xf32> to vector<8x512xf32>
    %115 = arith.mulf %112, %114 : vector<8x512xf32>
    %116 = vector.extract_strided_slice %0 {offsets = [4, 0], sizes = [1, 512], strides = [1, 1]} : vector<9x512xf32> to vector<1x512xf32>
    %117 = vector.broadcast %116 : vector<1x512xf32> to vector<8x512xf32>
    %118 = arith.mulf %96, %117 : vector<8x512xf32>
    %c511_i32_22 = arith.constant 511 : i32
    %119 = tpu.dynamic_rotate %96 by %c511_i32_22 dim 1 : vector<8x512xf32>, i32 -> vector<8x512xf32>
    %120 = vector.extract_strided_slice %0 {offsets = [5, 0], sizes = [1, 512], strides = [1, 1]} : vector<9x512xf32> to vector<1x512xf32>
    %121 = vector.broadcast %120 : vector<1x512xf32> to vector<8x512xf32>
    %122 = arith.mulf %119, %121 : vector<8x512xf32>
    %c497_i32_23 = arith.constant 497 : i32
    %123 = tpu.dynamic_rotate %96 by %c497_i32_23 dim 1 : vector<8x512xf32>, i32 -> vector<8x512xf32>
    %124 = vector.extract_strided_slice %0 {offsets = [6, 0], sizes = [1, 512], strides = [1, 1]} : vector<9x512xf32> to vector<1x512xf32>
    %125 = vector.broadcast %124 : vector<1x512xf32> to vector<8x512xf32>
    %126 = arith.mulf %123, %125 : vector<8x512xf32>
    %c496_i32_24 = arith.constant 496 : i32
    %127 = tpu.dynamic_rotate %96 by %c496_i32_24 dim 1 : vector<8x512xf32>, i32 -> vector<8x512xf32>
    %128 = vector.extract_strided_slice %0 {offsets = [7, 0], sizes = [1, 512], strides = [1, 1]} : vector<9x512xf32> to vector<1x512xf32>
    %129 = vector.broadcast %128 : vector<1x512xf32> to vector<8x512xf32>
    %130 = arith.mulf %127, %129 : vector<8x512xf32>
    %c495_i32_25 = arith.constant 495 : i32
    %131 = tpu.dynamic_rotate %96 by %c495_i32_25 dim 1 : vector<8x512xf32>, i32 -> vector<8x512xf32>
    %132 = vector.extract_strided_slice %0 {offsets = [8, 0], sizes = [1, 512], strides = [1, 1]} : vector<9x512xf32> to vector<1x512xf32>
    %133 = vector.broadcast %132 : vector<1x512xf32> to vector<8x512xf32>
    %134 = arith.mulf %131, %133 : vector<8x512xf32>
    %135 = tpu.concatenate %103, %107, %111, %115, %118, %122, %126, %130, %134 in 0 : vector<8x512xf32>, vector<8x512xf32>, vector<8x512xf32>, vector<8x512xf32>, vector<8x512xf32>, vector<8x512xf32>, vector<8x512xf32>, vector<8x512xf32>, vector<8x512xf32> -> vector<72x512xf32>
    %cst_26 = arith.constant dense<0.000000e+00> : vector<8x512xf32>
    %136 = tpu.matmul %98, %135, %cst_26 {dimension_numbers = #tpu.dot_dimension_numbers<[1], [0], [0], [1], [0, 0, 1, 1], [], []>} : vector<8x72xf32>, vector<72x512xf32>, vector<8x512xf32> -> vector<8x512xf32>
    %137 = vector.broadcast %99 : vector<8x1xf32> to vector<8x512xf32>
    %138 = arith.addf %136, %137 : vector<8x512xf32>
    %cst_27 = arith.constant 0.000000e+00 : f32
    %139 = vector.broadcast %cst_27 : f32 to vector<8x512xf32>
    %140 = arith.cmpf ogt, %138, %139 : vector<8x512xf32>
    %cst_28 = arith.constant 0.00999999977 : f32
    %141 = vector.broadcast %cst_28 : f32 to vector<8x512xf32>
    %142 = arith.mulf %141, %138 : vector<8x512xf32>
    %143 = arith.select %140, %138, %142 : vector<8x512xi1>, vector<8x512xf32>
    %144 = vector.extract_strided_slice %1 {offsets = [24, 0], sizes = [4, 17], strides = [1, 1]} : vector<32x128xf32> to vector<4x17xf32>
    %145 = vector.extract_strided_slice %144 {offsets = [0, 0], sizes = [4, 16], strides = [1, 1]} : vector<4x17xf32> to vector<4x16xf32>
    %146 = vector.extract_strided_slice %144 {offsets = [0, 16], sizes = [4, 1], strides = [1, 1]} : vector<4x17xf32> to vector<4x1xf32>
    %147 = vector.extract_strided_slice %145 {offsets = [0, 0], sizes = [4, 8], strides = [1, 1]} : vector<4x16xf32> to vector<4x8xf32>
    %cst_29 = arith.constant dense<0.000000e+00> : vector<4x512xf32>
    %148 = tpu.matmul %147, %143, %cst_29 {dimension_numbers = #tpu.dot_dimension_numbers<[1], [0], [0], [1], [0, 0, 1, 1], [], []>} : vector<4x8xf32>, vector<8x512xf32>, vector<4x512xf32> -> vector<4x512xf32>
    %149 = vector.extract_strided_slice %145 {offsets = [0, 8], sizes = [4, 8], strides = [1, 1]} : vector<4x16xf32> to vector<4x8xf32>
    %cst_30 = arith.constant dense<0.000000e+00> : vector<4x512xf32>
    %150 = tpu.matmul %149, %49, %cst_30 {dimension_numbers = #tpu.dot_dimension_numbers<[1], [0], [0], [1], [0, 0, 1, 1], [], []>} : vector<4x8xf32>, vector<8x512xf32>, vector<4x512xf32> -> vector<4x512xf32>
    %151 = arith.addf %148, %150 : vector<4x512xf32>
    %152 = vector.broadcast %146 : vector<4x1xf32> to vector<4x512xf32>
    %153 = arith.addf %151, %152 : vector<4x512xf32>
    %c0_31 = arith.constant 0 : index
    %c0_32 = arith.constant 0 : index
    %154 = vector.load %arg3[%c0_31, %c0_32] : memref<4x512xf32, #tpu.memory_space<vmem>>, vector<4x512xf32>
    tpu.vector_store %arg3[%c0_31, %c0_32], %153 {strides = array<i32>} : memref<4x512xf32, #tpu.memory_space<vmem>>, vector<4x512xf32>,
    return
  }
}

</mosaic_0001>

<bundles_post_ra>
// kernel: tpu_custom_call.1
= control target key start
LH: loop header
LB: loop body
LE: loop exit
PB: predicated region body
PF: predicated region fallthrough
CT: control target
= control target key end

     0   :  { %8 = vsyncpa [#allocation3], 0  ;;  %s2311_s0 = inlined_call_operand.hbm [shape: f32[8,512], index: 0, kind: input, shape index: {}]   ;;  %s2312_s1 = inlined_call_operand.hbm [shape: f32[9,512], index: 1, kind: input, shape index: {}]   ;;  %s2313_s2 = inlined_call_operand.hbm [shape: f32[32,128], index: 2, kind: input, shape index: {}]   ;;  %s2314_s3 = inlined_call_operand.hbm [shape: f32[4,512], index: 3, kind: output, shape index: {}]  }
   0x1   :  { %9 = vsyncpa [#allocation6], 0 }
   0x2   :  { %10 = vsyncpa [#allocation4], 0  ;;  %s1554_s12 = smov [#allocation5]  }
   0x3   :  { %s26_s13 = sshll.u32 %s1554_s12, 4  ;;  %s27_s13 = int_to_ptr.vmem [resolvable:$true] %s26_s13 }
   0x4   :  { %s1476_s14 = scalar_lea.vmem %s27_s13, 1024  ;;  %p1481_p1 = scmp.lt.s32.totalorder %s27_s13, %s27_s13 }
   0x5   :  { %p1477_p0 = scmp.ne.s32.totalorder %s27_s13, %s1476_s14  ;;  %p1482_p2 = scmp.lt.s32.totalorder %s1476_s14, %s1476_s14 }
   0x7   :  { %p1483_p3 = por %p1482_p2, %p1481_p1 }
   0x9   :  { %p1484_p4 = pnand %p1483_p3, %p1477_p0 }
   0xb   :  { %1487 = shalt.err (!%p1484_p4)
}
   0xc   :  { %s1555_s15 = smov 512   ;;  %s1556_s16 = smov 32  }
   0xd   :  { %32 = dma.hbm_to_vmem [thread:$0]  %s2312_s1, 1024, %s27_s13, [#allocation6], %s1555_s15, %s1555_s15, %s1556_s16  }
   0xe   :  { %s1557_s19 = smov [#allocation2]   ;;  %s1558_s21 = smov [#allocation7]  }
   0xf   :  { %s17_s20 = sshll.u32 %s1557_s19, 4  ;;  %s38_s22 = sshll.u32 %s1558_s21, 4  ;;  %s18_s20 = int_to_ptr.vmem [resolvable:$true] %s17_s20  ;;  %s39_s22 = int_to_ptr.vmem [resolvable:$true] %s38_s22 }
  0x10   :  { %s1496_s23 = scalar_lea.vmem %s18_s20, 512  ;;  %p1501_p6 = scmp.lt.s32.totalorder %s18_s20, %s18_s20 }
  0x11   :  { %p1497_p5 = scmp.ne.s32.totalorder %s18_s20, %s1496_s23  ;;  %p1502_p7 = scmp.lt.s32.totalorder %s1496_s23, %s1496_s23 }
  0x13   :  { %p1503_p8 = por %p1502_p7, %p1501_p6 }
  0x15   :  { %p1504_p9 = pnand %p1503_p8, %p1497_p5 }
  0x17   :  { %1507 = shalt.err (!%p1504_p9)
}
  0x18   :  { %20 = dma.hbm_to_vmem [thread:$0]  %s2311_s0, 512, %s18_s20, [#allocation3]  }
  0x19   :  { %s1516_s26 = scalar_lea.vmem %s39_s22, 512  ;;  %p1521_p11 = scmp.lt.s32.totalorder %s39_s22, %s39_s22 }
  0x1a   :  { %p1517_p10 = scmp.ne.s32.totalorder %s39_s22, %s1516_s26  ;;  %p1522_p12 = scmp.lt.s32.totalorder %s1516_s26, %s1516_s26 }
  0x1c   :  { %p1523_p13 = por %p1522_p12, %p1521_p11 }
  0x1e   :  { %p1524_p0 = pnand %p1523_p13, %p1517_p10 }
  0x20   :  { %1527 = shalt.err (!%p1524_p0)
}
  0x21   :  { %s1559_s1 = smov 128   ;;  %s1560_s27 = smov 8  }
  0x22   :  { %44 = dma.hbm_to_vmem [thread:$0]  %s2313_s2, 512, %s39_s22, [#allocation6], %s1559_s1, %s1559_s1, %s1560_s27  }
  0x23   :  { %1548 = dma.done.wait [#allocation3], 512  }
  0x24   :  { %1549 = vsyncadd [#allocation3], 4294966784 }
  0x25   :  { %1550 = dma.done.wait [#allocation6], 1536  }
  0x26   :  { %1551 = vsyncadd [#allocation6], 4294965760  ;;  %v1603_v0 = vld [vmem:[#allocation2 + $0x10] sm:$0xff]  ;;  %v1605_v1 = vld [vmem:[#allocation2] sm:$0xff]  ;;  %s1561_s0 = smov 111   ;;  %s1562_s2 = smov 112   ;;  %v78_v7 = vlaneseq }
  0x27   :  { %327 = vrot.lane.b32.xlu1 %v1603_v0, %s1561_s0  ;;  %323 = vrot.lane.b32.xlu0 %v1605_v1, %s1561_s0  ;;  %v1611_v2 = vld [vmem:[#allocation2 + $0x18] sm:$0xff]  ;;  %v1613_v3 = vld [vmem:[#allocation2 + $0x8] sm:$0xff]  ;;  %s1563_s30 = smov 113   ;;  %s1564_s4 = smov 127   ;;  %v1568_v4 = vmov 0.0   ;;  %v1569_v5 = vmov 72  }
  0x28   :  { %s1565_s5 = smov 1   ;;  %s1566_s6 = smov 15   ;;  %428 = vmatprep.mubr.f32.mxu0 %v1568_v4  ;;  %499 = vmatprep.mubr.f32.mxu1 %v1568_v4  ;;  %v1677_v6 = vld [vmem:[#allocation7] sm:$0xff]  ;;  %v1680_v8 = vand.u32 127, %v78_v7  ;;  %v1683_v11 = vshrl.u32 %v78_v7, 7  ;;  %v1706_v27 = vld [vmem:[#allocation5 + $0x18] sm:$0xff] }
  0x29   :  { %s1567_s7 = smov 16   ;;  %1464 = vset.pattern.permute.xlu0 %v1569_v5  ;;  %1465 = vset.pattern.permute.xlu1 %v1569_v5  ;;  %s1570_s8 = smov 17   ;;  %v1685_v12 = vld [vmem:[#allocation5 + $0x28] ss:$0 sm:$0xff]  ;;  %v1687_v13 = vld [vmem:[#allocation5 + $0x38] ss:$0 sm:$0xff] }
  0x2a   :  { %vm331_vm0 = vcmp.lt.s32.totalorder %v1680_v8, 111  ;;  %v1689_v14 = vld [vmem:[#allocation5 + $0x20] ss:$0 sm:$0xff]  ;;  %v1691_v15 = vld [vmem:[#allocation5 + $0x30] ss:$0 sm:$0xff]  ;;  %v305_v26 = vsub.s32 7, %v1683_v11 }
  0x2b   :  { %329 = vrot.lane.b32.xlu1 %v1611_v2, %s1561_s0  ;;  %325 = vrot.lane.b32.xlu0 %v1613_v3, %s1561_s0  ;;  %v1708_v28 = vld [vmem:[#allocation5 + $0x8] sm:$0xff]  ;;  %v1710_v29 = vld [vmem:[#allocation5 + $0x10] sm:$0xff]  ;;  %v1712_v32 = vld [vmem:[#allocation5] sm:$0xff]  ;;  %vm298_vm1 = vcmp.lt.s32.totalorder %v1680_v8, 112  ;;  %v272_v47 = vsub.s32 6, %v1683_v11  ;;  %vm265_vm2 = vcmp.lt.s32.totalorder %v1680_v8, 113 }
  0x2c   :  { %v1716_v33 = vrot.slane %v1706_v27, %v305_v26  ;;  %v1719_v34 = vrot.slane %v1708_v28, %v305_v26  ;;  %v1722_v35 = vrot.slane %v1710_v29, %v305_v26  ;;  %v1725_v36 = vrot.slane %v1712_v32, %v305_v26  ;;  %s1571_s9 = smov 120   ;;  %s1573_s10 = smov [#allocation8]  }
  0x2d   :  { %v1742_v50 = vrot.slane %v1706_v27, %v272_v47  ;;  %v1745_v51 = vrot.slane %v1708_v28, %v272_v47  ;;  %v1748_v52 = vrot.slane %v1710_v29, %v272_v47  ;;  %v1751_v53 = vrot.slane %v1712_v32, %v272_v47  ;;  %s1420_s11 = sshll.u32 %s1573_s10, 4  ;;  %s1421_s11 = int_to_ptr.vmem [resolvable:$true] %s1420_s11 }
  0x2e   :  { %v206_v60 = vsub.s32 4, %v1683_v11  ;;  %v239_v7 = vsub.s32 5, %v1683_v11  ;;  %vm232_vm3 = vcmp.lt.s32.totalorder %v1680_v8, 127  ;;  %vm179_vm4 = vcmp.lt.s32.totalorder %v1680_v8, 1  ;;  %s1528_s12 = scalar_lea.vmem %s1421_s11, 256  ;;  %p1533_p2 = scmp.lt.s32.totalorder %s1421_s11, %s1421_s11 }
  0x2f   :  { %292 = vrot.lane.b32.xlu1 %v1613_v3, %s1562_s2  ;;  %290 = vrot.lane.b32.xlu0 %v1605_v1, %s1562_s2  ;;  %vm146_vm5 = vcmp.lt.s32.totalorder %v1680_v8, 15  ;;  %vm113_vm6 = vcmp.lt.s32.totalorder %v1680_v8, 16  ;;  %vm80_vm7 = vcmp.lt.s32.totalorder %v1680_v8, 17  ;;  %vm361_vm8 = vcmask 588800   ;;  %p1529_p1 = scmp.ne.s32.totalorder %s1421_s11, %s1528_s12  ;;  %p1534_p3 = scmp.lt.s32.totalorder %s1528_s12, %s1528_s12 }
  0x31   :  { %p1535_p4 = por %p1534_p3, %p1533_p2 }
  0x33   :  { %296 = vrot.lane.b32.xlu1 %v1611_v2, %s1562_s2  ;;  %294 = vrot.lane.b32.xlu0 %v1603_v0, %s1562_s2  ;;  %p1536_p5 = pnand %p1535_p4, %p1529_p1 }
  0x37   :  { %259 = vrot.lane.b32.xlu1 %v1613_v3, %s1563_s30  ;;  %257 = vrot.lane.b32.xlu0 %v1605_v1, %s1563_s30 }
  0x3b   :  { %263 = vrot.lane.b32.xlu1 %v1611_v2, %s1563_s30  ;;  %261 = vrot.lane.b32.xlu0 %v1603_v0, %s1563_s30 }
  0x3f   :  { %226 = vrot.lane.b32.xlu1 %v1613_v3, %s1564_s4  ;;  %224 = vrot.lane.b32.xlu0 %v1605_v1, %s1564_s4 }
  0x43   :  { %230 = vrot.lane.b32.xlu1 %v1611_v2, %s1564_s4  ;;  %228 = vrot.lane.b32.xlu0 %v1603_v0, %s1564_s4 }
  0x47   :  { %173 = vrot.lane.b32.xlu1 %v1613_v3, %s1565_s5  ;;  %171 = vrot.lane.b32.xlu0 %v1605_v1, %s1565_s5 }
  0x4b   :  { %177 = vrot.lane.b32.xlu1 %v1611_v2, %s1565_s5  ;;  %175 = vrot.lane.b32.xlu0 %v1603_v0, %s1565_s5 }
  0x4f   :  { %140 = vrot.lane.b32.xlu1 %v1613_v3, %s1566_s6  ;;  %138 = vrot.lane.b32.xlu0 %v1605_v1, %s1566_s6 }
  0x53   :  { %144 = vrot.lane.b32.xlu1 %v1611_v2, %s1566_s6  ;;  %142 = vrot.lane.b32.xlu0 %v1603_v0, %s1566_s6 }
  0x57   :  { %107 = vrot.lane.b32.xlu1 %v1613_v3, %s1567_s7  ;;  %105 = vrot.lane.b32.xlu0 %v1605_v1, %s1567_s7 }
  0x5b   :  { %111 = vrot.lane.b32.xlu1 %v1611_v2, %s1567_s7  ;;  %109 = vrot.lane.b32.xlu0 %v1603_v0, %s1567_s7 }
  0x5f   :  { %72 = vrot.lane.b32.xlu1 %v1613_v3, %s1570_s8  ;;  %70 = vrot.lane.b32.xlu0 %v1605_v1, %s1570_s8 }
  0x63   :  { %76 = vrot.lane.b32.xlu1 %v1611_v2, %s1570_s8  ;;  %74 = vrot.lane.b32.xlu0 %v1603_v0, %s1570_s8 }
  0x67   :  { %358 = vperm.xlu0 %1464, %v1677_v6  }
  0x99   :  { %v328_v9 = vpop.permute.xlu1 %327  ;;  %v324_v10 = vpop.permute.xlu0 %323 }
  0x9d   :  { %v330_v16 = vpop.permute.xlu1 %329  ;;  %v326_v17 = vpop.permute.xlu0 %325 }
  0x9e   :  { %v334_v18 = vsel %vm331_vm0, %v324_v10, %v326_v17  ;;  %v333_v19 = vsel %vm331_vm0, %v326_v17, %v328_v9  ;;  %v335_v20 = vsel %vm331_vm0, %v330_v16, %v324_v10  ;;  %v332_v21 = vsel %vm331_vm0, %v328_v9, %v330_v16 }
  0x9f   :  { %v353_v22 = vmul.f32 %v1685_v12, %v333_v19  ;;  %v355_v23 = vmul.f32 %v1687_v13, %v335_v20  ;;  %v352_v24 = vmul.f32 %v1689_v14, %v334_v18  ;;  %v354_v25 = vmul.f32 %v1691_v15, %v332_v21 }
  0xa0   :  { %v186_v16 = vsub.s32 3, %v1683_v11  ;;  %v1770_v17 = vrot.slane %v1708_v28, %v206_v60  ;;  %v1773_v18 = vrot.slane %v1706_v27, %v239_v7  ;;  %v1776_v19 = vrot.slane %v1708_v28, %v239_v7 }
  0xa1   :  { %v293_v30 = vpop.permute.xlu1 %292  ;;  %v291_v31 = vpop.permute.xlu0 %290  ;;  %378 = vmatprep.subr.mxu0 %v353_v22  ;;  %449 = vmatprep.subr.mxu1 %v355_v23  ;;  %v1779_v20 = vrot.slane %v1710_v29, %v239_v7  ;;  %v1782_v21 = vrot.slane %v1706_v27, %v206_v60  ;;  %v1785_v22 = vrot.slane %v1712_v32, %v239_v7 }
  0xa2   :  { %379 = vmatpush1.msra.mxu0 %v352_v24  ;;  %450 = vmatpush1.msra.mxu1 %v354_v25  ;;  %v301_v37 = vsel %vm298_vm1, %v291_v31, %v293_v30  ;;  %v1788_v23 = vrot.slane %v1712_v32, %v206_v60  ;;  %v1791_v24 = vrot.slane %v1710_v29, %v206_v60 }
  0xa3   :  { %v319_v46 = vmul.f32 %v1725_v36, %v301_v37 }
  0xa4   :  { %v222_v47 = vmul.f32 %v1791_v24, %v1603_v0  ;;  %v1827_v0 = vrot.slane %v1706_v27, %v186_v16 }
  0xa5   :  { %v297_v38 = vpop.permute.xlu1 %296  ;;  %v295_v39 = vpop.permute.xlu0 %294 }
  0xa6   :  { %v302_v40 = vsel %vm298_vm1, %v297_v38, %v291_v31  ;;  %v299_v41 = vsel %vm298_vm1, %v295_v39, %v297_v38  ;;  %v300_v42 = vsel %vm298_vm1, %v293_v30, %v295_v39  ;;  %v1797_v31 = vrot.slane %v1708_v28, %v186_v16 }
  0xa7   :  { %v322_v43 = vmul.f32 %v1716_v33, %v302_v40  ;;  %v320_v44 = vmul.f32 %v1719_v34, %v300_v42  ;;  %v321_v45 = vmul.f32 %v1722_v35, %v299_v41  ;;  %v221_v40 = vmul.f32 %v1770_v17, %v1613_v3 }
  0xa9   :  { %v260_v48 = vpop.permute.xlu1 %259  ;;  %v258_v49 = vpop.permute.xlu0 %257  ;;  %380 = vmatprep.subr.mxu0 %v320_v44  ;;  %451 = vmatprep.subr.mxu1 %v322_v43  ;;  %v223_v44 = vmul.f32 %v1782_v21, %v1611_v2 }
  0xaa   :  { %381 = vmatpush1.msra.mxu0 %v319_v46  ;;  %452 = vmatpush1.msra.mxu1 %v321_v45  ;;  %v268_v54 = vsel %vm265_vm2, %v258_v49, %v260_v48  ;;  %v220_v46 = vmul.f32 %v1788_v23, %v1605_v1  ;;  %v1824_v1 = vrot.slane %v1710_v29, %v186_v16 }
  0xab   :  { %v286_v5 = vmul.f32 %v1751_v53, %v268_v54  ;;  %v1820_v54 = vrot.slane %v1712_v32, %v186_v16 }
  0xad   :  { %v264_v55 = vpop.permute.xlu1 %263  ;;  %v262_v56 = vpop.permute.xlu0 %261 }
  0xae   :  { %v269_v57 = vsel %vm265_vm2, %v264_v55, %v258_v49  ;;  %v266_v58 = vsel %vm265_vm2, %v262_v56, %v264_v55  ;;  %v267_v59 = vsel %vm265_vm2, %v260_v48, %v262_v56  ;;  %v153_v55 = vsub.s32 2, %v1683_v11 }
  0xaf   :  { %v289_v61 = vmul.f32 %v1742_v50, %v269_v57  ;;  %v287_v62 = vmul.f32 %v1745_v51, %v267_v59  ;;  %v288_v63 = vmul.f32 %v1748_v52, %v266_v58 }
  0xb0   :  { %v1846_v16 = vrot.slane %v1712_v32, %v153_v55 }
  0xb1   :  { %v227_v9 = vpop.permute.xlu1 %226  ;;  %v225_v10 = vpop.permute.xlu0 %224  ;;  %382 = vmatprep.subr.mxu0 %v287_v62  ;;  %453 = vmatprep.subr.mxu1 %v289_v61 }
  0xb2   :  { %383 = vmatpush1.msra.mxu0 %v286_v5  ;;  %454 = vmatpush1.msra.mxu1 %v288_v63  ;;  %v235_v25 = vsel %vm232_vm3, %v225_v10, %v227_v9  ;;  %v1841_v5 = vrot.slane %v1708_v28, %v153_v55 }
  0xb3   :  { %v253_v45 = vmul.f32 %v1785_v22, %v235_v25 }
  0xb5   :  { %v231_v26 = vpop.permute.xlu1 %230  ;;  %v229_v30 = vpop.permute.xlu0 %228 }
  0xb6   :  { %v236_v37 = vsel %vm232_vm3, %v231_v26, %v225_v10  ;;  %v233_v38 = vsel %vm232_vm3, %v229_v30, %v231_v26  ;;  %v234_v39 = vsel %vm232_vm3, %v227_v9, %v229_v30  ;;  %v1850_v26 = vrot.slane %v1710_v29, %v153_v55 }
  0xb7   :  { %v256_v41 = vmul.f32 %v1773_v18, %v236_v37  ;;  %v254_v42 = vmul.f32 %v1776_v19, %v234_v39  ;;  %v255_v43 = vmul.f32 %v1779_v20, %v233_v38  ;;  %v1853_v30 = vrot.slane %v1706_v27, %v153_v55 }
  0xb8   :  { %v120_v37 = vsub.s32 1, %v1683_v11 }
  0xb9   :  { %v174_v48 = vpop.permute.xlu1 %173  ;;  %v172_v49 = vpop.permute.xlu0 %171  ;;  %384 = vmatprep.subr.mxu0 %v254_v42  ;;  %455 = vmatprep.subr.mxu1 %v256_v41 }
  0xba   :  { %v182_v3 = vsel %vm179_vm4, %v172_v49, %v174_v48  ;;  %385 = vmatpush1.msra.mxu0 %v253_v45  ;;  %456 = vmatpush1.msra.mxu1 %v255_v43  ;;  %v1876_v55 = vrot.slane %v1710_v29, %v120_v37 }
  0xbb   :  { %v201_v2 = vmul.f32 %v1797_v31, %v182_v3  ;;  %386 = vmatprep.subr.mxu0 %v221_v40  ;;  %457 = vmatprep.subr.mxu1 %v223_v44  ;;  %v1872_v3 = vrot.slane %v1712_v32, %v120_v37 }
  0xbc   :  { %387 = vmatpush1.msra.mxu0 %v220_v46  ;;  %458 = vmatpush1.msra.mxu1 %v222_v47  ;;  %v1867_v46 = vrot.slane %v1708_v28, %v120_v37 }
  0xbd   :  { %v178_v56 = vpop.permute.xlu1 %177  ;;  %v176_v57 = vpop.permute.xlu0 %175  ;;  %388 = vmatprep.subr.mxu0 %v201_v2 }
  0xbe   :  { %v183_v58 = vsel %vm179_vm4, %v178_v56, %v172_v49  ;;  %v180_v59 = vsel %vm179_vm4, %v176_v57, %v178_v56  ;;  %v181_v60 = vsel %vm179_vm4, %v174_v48, %v176_v57  ;;  %v1879_v56 = vrot.slane %v1706_v27, %v120_v37 }
  0xbf   :  { %v200_v61 = vmul.f32 %v1820_v54, %v183_v58  ;;  %v202_v62 = vmul.f32 %v1824_v1, %v181_v60  ;;  %v203_v63 = vmul.f32 %v1827_v0, %v180_v59  ;;  %v87_v57 = vsub.s32 0, %v1683_v11 }
  0xc1   :  { %v141_v7 = vpop.permute.xlu1 %140  ;;  %v139_v9 = vpop.permute.xlu0 %138  ;;  %389 = vmatpush1.msra.mxu0 %v200_v61  ;;  %459 = vmatprep.subr.mxu1 %v203_v63 }
  0xc2   :  { %v149_v10 = vsel %vm146_vm5, %v139_v9, %v141_v7  ;;  %460 = vmatpush1.msra.mxu1 %v202_v62 }
  0xc3   :  { %v168_v25 = vmul.f32 %v1841_v5, %v149_v10 }
  0xc5   :  { %v145_v38 = vpop.permute.xlu1 %144  ;;  %v143_v39 = vpop.permute.xlu0 %142  ;;  %390 = vmatprep.subr.mxu0 %v168_v25 }
  0xc6   :  { %v150_v40 = vsel %vm146_vm5, %v145_v38, %v139_v9  ;;  %v147_v41 = vsel %vm146_vm5, %v143_v39, %v145_v38  ;;  %v148_v42 = vsel %vm146_vm5, %v141_v7, %v143_v39  ;;  %v1893_v9 = vrot.slane %v1708_v28, %v87_v57 }
  0xc7   :  { %v167_v43 = vmul.f32 %v1846_v16, %v150_v40  ;;  %v169_v44 = vmul.f32 %v1850_v26, %v148_v42  ;;  %v170_v45 = vmul.f32 %v1853_v30, %v147_v41  ;;  %v1899_v39 = vrot.slane %v1712_v32, %v87_v57 }
  0xc8   :  { %v1902_v40 = vrot.slane %v1710_v29, %v87_v57  ;;  %v1905_v41 = vrot.slane %v1706_v27, %v87_v57 }
  0xc9   :  { %v108_v47 = vpop.permute.xlu1 %107  ;;  %v106_v48 = vpop.permute.xlu0 %105  ;;  %391 = vmatpush1.msra.mxu0 %v167_v43  ;;  %461 = vmatprep.subr.mxu1 %v170_v45 }
  0xca   :  { %v116_v49 = vsel %vm113_vm6, %v106_v48, %v108_v47  ;;  %462 = vmatpush1.msra.mxu1 %v169_v44 }
  0xcb   :  { %v135_v2 = vmul.f32 %v1867_v46, %v116_v49 }
  0xcd   :  { %v112_v58 = vpop.permute.xlu1 %111  ;;  %v110_v59 = vpop.permute.xlu0 %109  ;;  %392 = vmatprep.subr.mxu0 %v135_v2 }
  0xce   :  { %v117_v60 = vsel %vm113_vm6, %v112_v58, %v106_v48  ;;  %v114_v61 = vsel %vm113_vm6, %v110_v59, %v112_v58  ;;  %v115_v62 = vsel %vm113_vm6, %v108_v47, %v110_v59 }
  0xcf   :  { %v134_v63 = vmul.f32 %v1872_v3, %v117_v60  ;;  %v136_v7 = vmul.f32 %v1876_v55, %v115_v62  ;;  %v137_v11 = vmul.f32 %v1879_v56, %v114_v61 }
  0xd1   :  { %v73_v10 = vpop.permute.xlu1 %72  ;;  %v71_v25 = vpop.permute.xlu0 %70  ;;  %393 = vmatpush1.msra.mxu0 %v134_v63  ;;  %463 = vmatprep.subr.mxu1 %v137_v11 }
  0xd2   :  { %v83_v37 = vsel %vm80_vm7, %v71_v25, %v73_v10  ;;  %464 = vmatpush1.msra.mxu1 %v136_v7 }
  0xd3   :  { %v102_v38 = vmul.f32 %v1893_v9, %v83_v37 }
  0xd5   :  { %v77_v28 = vpop.permute.xlu1 %76  ;;  %v75_v42 = vpop.permute.xlu0 %74  ;;  %394 = vmatprep.subr.mxu0 %v102_v38  ;;  %v1990_v38 = vld [vmem:[#allocation7 + $0x8] sm:$0xff] }
  0xd6   :  { %v84_v43 = vsel %vm80_vm7, %v77_v28, %v71_v25  ;;  %v81_v44 = vsel %vm80_vm7, %v75_v42, %v77_v28  ;;  %v82_v45 = vsel %vm80_vm7, %v73_v10, %v75_v42 }
  0xd7   :  { %v101_v32 = vmul.f32 %v1899_v39, %v84_v43  ;;  %v103_v29 = vmul.f32 %v1902_v40, %v82_v45  ;;  %v104_v47 = vmul.f32 %v1905_v41, %v81_v44 }
  0xd9   :  { %395 = vmatpush1.msra.mxu0 %v101_v32  ;;  %465 = vmatprep.subr.mxu1 %v104_v47 }
  0xda   :  { %1434 = vmatmul.mubr.msk.f32.vlgmr.msra.gmra.mxu0 %vm361_vm8, %v1677_v6  ;;  %466 = vmatpush1.msra.mxu1 %v103_v29 }
  0xdb   :  { %1435 = vmatmul.mubr.msk.f32.vlgmr.msra.gmra.mxu1 %vm361_vm8, %v1677_v6  ;;  %721 = vmatprep.mubr.f32.mxu0 %v1568_v4 }
  0xdc   :  { %792 = vmatprep.mubr.f32.mxu1 %v1568_v4 }
  0xe2   :  { %v359_v27 = vpop.permute.xlu0 %358 }
 0x19a   :  { %v430_v48 = vpop.f32.mrf.mxu0 }
 0x19b   :  { %v431_v49 = vadd.f32 %v430_v48, %v359_v27  ;;  %v501_v2 = vpop.f32.mrf.mxu1 }
 0x19c   :  { %v502_v57 = vadd.f32 %v501_v2, %v359_v27  ;;  %v432_v58 = vpop.f32.mrf.mxu0 }
 0x19d   :  { %vm506_vm9 = vcmp.gt.f32.partialorder %v431_v49, 0.0  ;;  %v510_v59 = vmul.f32 0.01, %v431_v49  ;;  %v433_v60 = vadd.f32 %v432_v58, %v359_v27  ;;  %v503_v61 = vpop.f32.mrf.mxu1 }
 0x19e   :  { %vm508_vm10 = vcmp.gt.f32.partialorder %v502_v57, 0.0  ;;  %v512_v62 = vmul.f32 0.01, %v502_v57  ;;  %v504_v6 = vadd.f32 %v503_v61, %v359_v27 }
 0x19f   :  { %v1922_v63 = vsel %vm506_vm9, %v431_v49, %v510_v59  ;;  %v511_v7 = vmul.f32 0.01, %v433_v60  ;;  %vm507_vm11 = vcmp.gt.f32.partialorder %v433_v60, 0.0 }
 0x1a0   :  { %v1924_v11 = vsel %vm508_vm10, %v502_v57, %v512_v62  ;;  %634 = vrot.lane.b32.xlu1 %v1922_v63, %s1561_s0  ;;  %v513_v25 = vmul.f32 0.01, %v504_v6  ;;  %vm509_vm12 = vcmp.gt.f32.partialorder %v504_v6, 0.0 }
 0x1a1   :  { %638 = vrot.lane.b32.xlu0 %v1924_v11, %s1561_s0  ;;  %v1930_v10 = vsel %vm507_vm11, %v433_v60, %v511_v7 }
 0x1a2   :  { %v1936_v37 = vsel %vm509_vm12, %v504_v6, %v513_v25 }
 0x1a4   :  { %636 = vrot.lane.b32.xlu1 %v1930_v10, %s1561_s0 }
 0x1a5   :  { %618 = vrot.lane.b32.xlu0 %v1922_v63, %s1562_s2 }
 0x1a8   :  { %640 = vrot.lane.b32.xlu1 %v1936_v37, %s1561_s0 }
 0x1a9   :  { %622 = vrot.lane.b32.xlu0 %v1924_v11, %s1562_s2 }
 0x1ac   :  { %620 = vrot.lane.b32.xlu1 %v1930_v10, %s1562_s2 }
 0x1ad   :  { %602 = vrot.lane.b32.xlu0 %v1922_v63, %s1563_s30 }
 0x1b0   :  { %624 = vrot.lane.b32.xlu1 %v1936_v37, %s1562_s2 }
 0x1b1   :  { %606 = vrot.lane.b32.xlu0 %v1924_v11, %s1563_s30 }
 0x1b4   :  { %604 = vrot.lane.b32.xlu1 %v1930_v10, %s1563_s30 }
 0x1b5   :  { %586 = vrot.lane.b32.xlu0 %v1922_v63, %s1564_s4 }
 0x1b8   :  { %608 = vrot.lane.b32.xlu1 %v1936_v37, %s1563_s30 }
 0x1b9   :  { %590 = vrot.lane.b32.xlu0 %v1924_v11, %s1564_s4 }
 0x1bc   :  { %588 = vrot.lane.b32.xlu1 %v1930_v10, %s1564_s4 }
 0x1bd   :  { %566 = vrot.lane.b32.xlu0 %v1922_v63, %s1565_s5 }
 0x1c0   :  { %592 = vrot.lane.b32.xlu1 %v1936_v37, %s1564_s4 }
 0x1c1   :  { %570 = vrot.lane.b32.xlu0 %v1924_v11, %s1565_s5 }
 0x1c4   :  { %568 = vrot.lane.b32.xlu1 %v1930_v10, %s1565_s5 }
 0x1c5   :  { %550 = vrot.lane.b32.xlu0 %v1922_v63, %s1566_s6 }
 0x1c8   :  { %572 = vrot.lane.b32.xlu1 %v1936_v37, %s1565_s5 }
 0x1c9   :  { %554 = vrot.lane.b32.xlu0 %v1924_v11, %s1566_s6 }
 0x1cc   :  { %552 = vrot.lane.b32.xlu1 %v1930_v10, %s1566_s6 }
 0x1cd   :  { %534 = vrot.lane.b32.xlu0 %v1922_v63, %s1567_s7 }
 0x1d0   :  { %556 = vrot.lane.b32.xlu1 %v1936_v37, %s1566_s6 }
 0x1d1   :  { %538 = vrot.lane.b32.xlu0 %v1924_v11, %s1567_s7 }
 0x1d4   :  { %536 = vrot.lane.b32.xlu1 %v1930_v10, %s1567_s7 }
 0x1d5   :  { %518 = vrot.lane.b32.xlu0 %v1922_v63, %s1570_s8 }
 0x1d8   :  { %540 = vrot.lane.b32.xlu1 %v1936_v37, %s1567_s7 }
 0x1d9   :  { %522 = vrot.lane.b32.xlu0 %v1924_v11, %s1570_s8 }
 0x1dc   :  { %520 = vrot.lane.b32.xlu1 %v1930_v10, %s1570_s8 }
 0x1dd   :  { %652 = vperm.xlu0 %1464, %v1990_v38  }
 0x1e0   :  { %524 = vrot.lane.b32.xlu1 %v1936_v37, %s1570_s8 }
 0x212   :  { %v635_v28 = vpop.permute.xlu1 %634 }
 0x213   :  { %v639_v42 = vpop.permute.xlu0 %638 }
 0x216   :  { %v637_v43 = vpop.permute.xlu1 %636 }
 0x217   :  { %v643_v44 = vsel %vm331_vm0, %v637_v43, %v639_v42  ;;  %v644_v45 = vsel %vm331_vm0, %v635_v28, %v637_v43  ;;  %v619_v32 = vpop.permute.xlu0 %618 }
 0x218   :  { %v646_v29 = vmul.f32 %v1689_v14, %v644_v45  ;;  %v647_v47 = vmul.f32 %v1685_v12, %v643_v44 }
 0x21a   :  { %671 = vmatprep.subr.mxu0 %v647_v47  ;;  %v641_v27 = vpop.permute.xlu1 %640 }
 0x21b   :  { %v642_v48 = vsel %vm331_vm0, %v639_v42, %v641_v27  ;;  %v645_v49 = vsel %vm331_vm0, %v641_v27, %v635_v28  ;;  %v623_v2 = vpop.permute.xlu0 %622  ;;  %672 = vmatpush1.msra.mxu0 %v646_v29 }
 0x21c   :  { %v648_v57 = vmul.f32 %v1691_v15, %v642_v48  ;;  %v649_v58 = vmul.f32 %v1687_v13, %v645_v49 }
 0x21e   :  { %742 = vmatprep.subr.mxu1 %v649_v58  ;;  %v621_v59 = vpop.permute.xlu1 %620 }
 0x21f   :  { %v627_v60 = vsel %vm298_vm1, %v621_v59, %v623_v2  ;;  %v628_v61 = vsel %vm298_vm1, %v619_v32, %v621_v59  ;;  %v603_v62 = vpop.permute.xlu0 %602  ;;  %743 = vmatpush1.msra.mxu1 %v648_v57 }
 0x220   :  { %v630_v7 = vmul.f32 %v628_v61, %v1725_v36  ;;  %v631_v6 = vmul.f32 %v627_v60, %v1719_v34 }
 0x222   :  { %673 = vmatprep.subr.mxu0 %v631_v6  ;;  %v625_v25 = vpop.permute.xlu1 %624 }
 0x223   :  { %v626_v28 = vsel %vm298_vm1, %v623_v2, %v625_v25  ;;  %v629_v42 = vsel %vm298_vm1, %v625_v25, %v619_v32  ;;  %v607_v43 = vpop.permute.xlu0 %606  ;;  %674 = vmatpush1.msra.mxu0 %v630_v7 }
 0x224   :  { %v632_v44 = vmul.f32 %v626_v28, %v1722_v35  ;;  %v633_v45 = vmul.f32 %v629_v42, %v1716_v33 }
 0x226   :  { %744 = vmatprep.subr.mxu1 %v633_v45  ;;  %v605_v29 = vpop.permute.xlu1 %604 }
 0x227   :  { %v611_v47 = vsel %vm265_vm2, %v605_v29, %v607_v43  ;;  %v612_v27 = vsel %vm265_vm2, %v603_v62, %v605_v29  ;;  %v587_v48 = vpop.permute.xlu0 %586  ;;  %745 = vmatpush1.msra.mxu1 %v632_v44  ;;  %v583_v44 = vmul.f32 %v1930_v10, %v1770_v17 }
 0x228   :  { %v614_v49 = vmul.f32 %v612_v27, %v1751_v53  ;;  %v615_v32 = vmul.f32 %v611_v47, %v1745_v51  ;;  %v582_v27 = vmul.f32 %v1922_v63, %v1788_v23 }
 0x22a   :  { %675 = vmatprep.subr.mxu0 %v615_v32  ;;  %v609_v2 = vpop.permute.xlu1 %608 }
 0x22b   :  { %v610_v57 = vsel %vm265_vm2, %v607_v43, %v609_v2  ;;  %v613_v58 = vsel %vm265_vm2, %v609_v2, %v603_v62  ;;  %v591_v59 = vpop.permute.xlu0 %590  ;;  %676 = vmatpush1.msra.mxu0 %v614_v49 }
 0x22c   :  { %v616_v60 = vmul.f32 %v610_v57, %v1748_v52  ;;  %v617_v61 = vmul.f32 %v613_v58, %v1742_v50  ;;  %v585_v57 = vmul.f32 %v1936_v37, %v1782_v21 }
 0x22e   :  { %746 = vmatprep.subr.mxu1 %v617_v61  ;;  %v589_v7 = vpop.permute.xlu1 %588 }
 0x22f   :  { %v595_v6 = vsel %vm232_vm3, %v589_v7, %v591_v59  ;;  %v596_v25 = vsel %vm232_vm3, %v587_v48, %v589_v7  ;;  %v567_v28 = vpop.permute.xlu0 %566  ;;  %747 = vmatpush1.msra.mxu1 %v616_v60 }
 0x230   :  { %v598_v42 = vmul.f32 %v596_v25, %v1785_v22  ;;  %v599_v62 = vmul.f32 %v595_v6, %v1776_v19 }
 0x232   :  { %677 = vmatprep.subr.mxu0 %v599_v62  ;;  %v593_v43 = vpop.permute.xlu1 %592 }
 0x233   :  { %v594_v45 = vsel %vm232_vm3, %v591_v59, %v593_v43  ;;  %v597_v29 = vsel %vm232_vm3, %v593_v43, %v587_v48  ;;  %v571_v47 = vpop.permute.xlu0 %570  ;;  %678 = vmatpush1.msra.mxu0 %v598_v42  ;;  %v584_v59 = vmul.f32 %v1924_v11, %v1791_v24 }
 0x234   :  { %v600_v49 = vmul.f32 %v594_v45, %v1779_v20  ;;  %v601_v32 = vmul.f32 %v597_v29, %v1773_v18  ;;  %679 = vmatprep.subr.mxu0 %v583_v44 }
 0x235   :  { %680 = vmatpush1.msra.mxu0 %v582_v27 }
 0x236   :  { %748 = vmatprep.subr.mxu1 %v601_v32  ;;  %v569_v2 = vpop.permute.xlu1 %568 }
 0x237   :  { %v576_v58 = vsel %vm179_vm4, %v567_v28, %v569_v2  ;;  %v551_v48 = vpop.permute.xlu0 %550  ;;  %749 = vmatpush1.msra.mxu1 %v600_v49  ;;  %v575_v61 = vsel %vm179_vm4, %v569_v2, %v571_v47 }
 0x238   :  { %v579_v60 = vmul.f32 %v576_v58, %v1797_v31  ;;  %750 = vmatprep.subr.mxu1 %v585_v57  ;;  %v580_v44 = vmul.f32 %v575_v61, %v1824_v1 }
 0x239   :  { %751 = vmatpush1.msra.mxu1 %v584_v59 }
 0x23a   :  { %v573_v7 = vpop.permute.xlu1 %572  ;;  %681 = vmatprep.subr.mxu0 %v579_v60 }
 0x23b   :  { %v574_v6 = vsel %vm179_vm4, %v571_v47, %v573_v7  ;;  %v577_v25 = vsel %vm179_vm4, %v573_v7, %v567_v28  ;;  %v555_v42 = vpop.permute.xlu0 %554 }
 0x23c   :  { %v578_v62 = vmul.f32 %v577_v25, %v1820_v54  ;;  %v581_v43 = vmul.f32 %v574_v6, %v1827_v0 }
 0x23e   :  { %752 = vmatprep.subr.mxu1 %v581_v43  ;;  %v553_v45 = vpop.permute.xlu1 %552  ;;  %682 = vmatpush1.msra.mxu0 %v578_v62 }
 0x23f   :  { %v560_v29 = vsel %vm146_vm5, %v551_v48, %v553_v45  ;;  %v535_v27 = vpop.permute.xlu0 %534  ;;  %753 = vmatpush1.msra.mxu1 %v580_v44  ;;  %v559_v28 = vsel %vm146_vm5, %v553_v45, %v555_v42 }
 0x240   :  { %v563_v47 = vmul.f32 %v560_v29, %v1841_v5  ;;  %v564_v59 = vmul.f32 %v559_v28, %v1850_v26 }
 0x242   :  { %v557_v49 = vpop.permute.xlu1 %556  ;;  %683 = vmatprep.subr.mxu0 %v563_v47 }
 0x243   :  { %v558_v32 = vsel %vm146_vm5, %v555_v42, %v557_v49  ;;  %v561_v2 = vsel %vm146_vm5, %v557_v49, %v551_v48  ;;  %v539_v60 = vpop.permute.xlu0 %538 }
 0x244   :  { %v562_v57 = vmul.f32 %v561_v2, %v1846_v16  ;;  %v565_v58 = vmul.f32 %v558_v32, %v1853_v30 }
 0x246   :  { %754 = vmatprep.subr.mxu1 %v565_v58  ;;  %v537_v61 = vpop.permute.xlu1 %536  ;;  %684 = vmatpush1.msra.mxu0 %v562_v57 }
 0x247   :  { %v544_v7 = vsel %vm113_vm6, %v535_v27, %v537_v61  ;;  %755 = vmatpush1.msra.mxu1 %v564_v59  ;;  %v543_v25 = vsel %vm113_vm6, %v537_v61, %v539_v60  ;;  %v519_v42 = vpop.permute.xlu0 %518 }
 0x248   :  { %v547_v6 = vmul.f32 %v544_v7, %v1867_v46  ;;  %v548_v29 = vmul.f32 %v543_v25, %v1876_v55 }
 0x24a   :  { %v541_v48 = vpop.permute.xlu1 %540  ;;  %685 = vmatprep.subr.mxu0 %v547_v6 }
 0x24b   :  { %v542_v62 = vsel %vm113_vm6, %v539_v60, %v541_v48  ;;  %v545_v43 = vsel %vm113_vm6, %v541_v48, %v535_v27  ;;  %v523_v32 = vpop.permute.xlu0 %522 }
 0x24c   :  { %v546_v44 = vmul.f32 %v545_v43, %v1872_v3  ;;  %v549_v45 = vmul.f32 %v542_v62, %v1879_v56 }
 0x24e   :  { %756 = vmatprep.subr.mxu1 %v549_v45  ;;  %v521_v47 = vpop.permute.xlu1 %520  ;;  %686 = vmatpush1.msra.mxu0 %v546_v44 }
 0x24f   :  { %v528_v28 = vsel %vm80_vm7, %v519_v42, %v521_v47  ;;  %757 = vmatpush1.msra.mxu1 %v548_v29  ;;  %v527_v2 = vsel %vm80_vm7, %v521_v47, %v523_v32 }
 0x250   :  { %v531_v49 = vmul.f32 %v528_v28, %v1893_v9  ;;  %v532_v61 = vmul.f32 %v527_v2, %v1902_v40 }
 0x252   :  { %v525_v27 = vpop.permute.xlu1 %524  ;;  %687 = vmatprep.subr.mxu0 %v531_v49 }
 0x253   :  { %v526_v57 = vsel %vm80_vm7, %v523_v32, %v525_v27  ;;  %v529_v58 = vsel %vm80_vm7, %v525_v27, %v519_v42 }
 0x254   :  { %v530_v59 = vmul.f32 %v529_v58, %v1899_v39  ;;  %v533_v60 = vmul.f32 %v526_v57, %v1905_v41  ;;  %v2179_v57 = vld [vmem:[#allocation7 + $0x10] sm:$0xff]  ;;  %v2181_v58 = vld [vmem:[#allocation7 + $0x18] sm:$0xff] }
 0x256   :  { %688 = vmatpush1.msra.mxu0 %v530_v59  ;;  %758 = vmatprep.subr.mxu1 %v533_v60 }
 0x257   :  { %1436 = vmatmul.mubr.msk.f32.vlgmr.msra.gmra.mxu0 %vm361_vm8, %v1990_v38  ;;  %759 = vmatpush1.msra.mxu1 %v532_v61 }
 0x258   :  { %1437 = vmatmul.mubr.msk.f32.vlgmr.msra.gmra.mxu1 %vm361_vm8, %v1990_v38  ;;  %1014 = vmatprep.mubr.f32.mxu0 %v1568_v4  ;;  %v653_v7 = vpop.permute.xlu0 %652 }
 0x259   :  { %1085 = vmatprep.mubr.f32.mxu1 %v1568_v4 }
 0x317   :  { %v723_v6 = vpop.f32.mrf.mxu0 }
 0x318   :  { %v724_v25 = vadd.f32 %v723_v6, %v653_v7  ;;  %v794_v48 = vpop.f32.mrf.mxu1 }
 0x319   :  { %v795_v42 = vadd.f32 %v794_v48, %v653_v7  ;;  %v725_v62 = vpop.f32.mrf.mxu0 }
 0x31a   :  { %vm799_vm13 = vcmp.gt.f32.partialorder %v724_v25, 0.0  ;;  %v803_v43 = vmul.f32 0.01, %v724_v25  ;;  %v726_v44 = vadd.f32 %v725_v62, %v653_v7  ;;  %v796_v45 = vpop.f32.mrf.mxu1 }
 0x31b   :  { %v797_v29 = vadd.f32 %v796_v45, %v653_v7  ;;  %v805_v28 = vmul.f32 0.01, %v795_v42  ;;  %vm801_vm15 = vcmp.gt.f32.partialorder %v795_v42, 0.0 }
 0x31c   :  { %v2107_v47 = vsel %vm799_vm13, %v724_v25, %v803_v43  ;;  %vm800_vm14 = vcmp.gt.f32.partialorder %v726_v44, 0.0  ;;  %v804_v38 = vmul.f32 0.01, %v726_v44 }
 0x31d   :  { %927 = vrot.lane.b32.xlu1 %v2107_v47, %s1561_s0  ;;  %v806_v32 = vmul.f32 0.01, %v797_v29  ;;  %vm802_vm9 = vcmp.gt.f32.partialorder %v797_v29, 0.0  ;;  %v2115_v2 = vsel %vm801_vm15, %v795_v42, %v805_v28 }
 0x31e   :  { %v2111_v49 = vsel %vm800_vm14, %v726_v44, %v804_v38 }
 0x31f   :  { %929 = vrot.lane.b32.xlu0 %v2111_v49, %s1561_s0  ;;  %v2119_v27 = vsel %vm802_vm9, %v797_v29, %v806_v32 }
 0x321   :  { %931 = vrot.lane.b32.xlu1 %v2115_v2, %s1561_s0 }
 0x323   :  { %933 = vrot.lane.b32.xlu0 %v2119_v27, %s1561_s0 }
 0x325   :  { %911 = vrot.lane.b32.xlu1 %v2107_v47, %s1562_s2 }
 0x327   :  { %913 = vrot.lane.b32.xlu0 %v2111_v49, %s1562_s2 }
 0x329   :  { %915 = vrot.lane.b32.xlu1 %v2115_v2, %s1562_s2 }
 0x32b   :  { %917 = vrot.lane.b32.xlu0 %v2119_v27, %s1562_s2 }
 0x32d   :  { %895 = vrot.lane.b32.xlu1 %v2107_v47, %s1563_s30 }
 0x32f   :  { %897 = vrot.lane.b32.xlu0 %v2111_v49, %s1563_s30 }
 0x331   :  { %899 = vrot.lane.b32.xlu1 %v2115_v2, %s1563_s30 }
 0x333   :  { %901 = vrot.lane.b32.xlu0 %v2119_v27, %s1563_s30 }
 0x335   :  { %879 = vrot.lane.b32.xlu1 %v2107_v47, %s1564_s4 }
 0x337   :  { %881 = vrot.lane.b32.xlu0 %v2111_v49, %s1564_s4 }
 0x339   :  { %883 = vrot.lane.b32.xlu1 %v2115_v2, %s1564_s4 }
 0x33b   :  { %885 = vrot.lane.b32.xlu0 %v2119_v27, %s1564_s4 }
 0x33d   :  { %859 = vrot.lane.b32.xlu1 %v2107_v47, %s1565_s5 }
 0x33f   :  { %861 = vrot.lane.b32.xlu0 %v2111_v49, %s1565_s5 }
 0x341   :  { %863 = vrot.lane.b32.xlu1 %v2115_v2, %s1565_s5 }
 0x343   :  { %865 = vrot.lane.b32.xlu0 %v2119_v27, %s1565_s5 }
 0x345   :  { %843 = vrot.lane.b32.xlu1 %v2107_v47, %s1566_s6 }
 0x347   :  { %845 = vrot.lane.b32.xlu0 %v2111_v49, %s1566_s6 }
 0x349   :  { %847 = vrot.lane.b32.xlu1 %v2115_v2, %s1566_s6 }
 0x34b   :  { %849 = vrot.lane.b32.xlu0 %v2119_v27, %s1566_s6 }
 0x34d   :  { %827 = vrot.lane.b32.xlu1 %v2107_v47, %s1567_s7 }
 0x34f   :  { %829 = vrot.lane.b32.xlu0 %v2111_v49, %s1567_s7 }
 0x351   :  { %831 = vrot.lane.b32.xlu1 %v2115_v2, %s1567_s7 }
 0x353   :  { %833 = vrot.lane.b32.xlu0 %v2119_v27, %s1567_s7 }
 0x355   :  { %811 = vrot.lane.b32.xlu1 %v2107_v47, %s1570_s8 }
 0x357   :  { %813 = vrot.lane.b32.xlu0 %v2111_v49, %s1570_s8 }
 0x359   :  { %815 = vrot.lane.b32.xlu1 %v2115_v2, %s1570_s8 }
 0x35b   :  { %817 = vrot.lane.b32.xlu0 %v2119_v27, %s1570_s8 }
 0x35d   :  { %945 = vperm.xlu1 %1465, %v2179_v57  }
 0x35f   :  { %1105 = vrot.lane.b32.xlu0 %v2181_v58, %s1571_s9 }
 0x38f   :  { %v928_v59 = vpop.permute.xlu1 %927 }
 0x391   :  { %v930_v60 = vpop.permute.xlu0 %929 }
 0x392   :  { %v937_v61 = vsel %vm331_vm0, %v928_v59, %v930_v60 }
 0x393   :  { %v932_v7 = vpop.permute.xlu1 %931  ;;  %v939_v42 = vmul.f32 %v1689_v14, %v937_v61 }
 0x394   :  { %v936_v6 = vsel %vm331_vm0, %v930_v60, %v932_v7 }
 0x395   :  { %v940_v25 = vmul.f32 %v1685_v12, %v936_v6  ;;  %v934_v48 = vpop.permute.xlu0 %933 }
 0x396   :  { %v935_v62 = vsel %vm331_vm0, %v932_v7, %v934_v48  ;;  %v938_v43 = vsel %vm331_vm0, %v934_v48, %v928_v59  ;;  %vm1107_vm0 = vcmask 64512  }
 0x397   :  { %v941_v44 = vmul.f32 %v1691_v15, %v935_v62  ;;  %v942_v45 = vmul.f32 %v1687_v13, %v938_v43  ;;  %964 = vmatprep.subr.mxu0 %v940_v25  ;;  %v912_v29 = vpop.permute.xlu1 %911 }
 0x398   :  { %965 = vmatpush1.msra.mxu0 %v939_v42 }
 0x399   :  { %v914_v28 = vpop.permute.xlu0 %913  ;;  %1035 = vmatprep.subr.mxu1 %v942_v45 }
 0x39a   :  { %1036 = vmatpush1.msra.mxu1 %v941_v44  ;;  %v921_v12 = vsel %vm298_vm1, %v912_v29, %v914_v28 }
 0x39b   :  { %v916_v14 = vpop.permute.xlu1 %915  ;;  %v923_v15 = vmul.f32 %v921_v12, %v1725_v36 }
 0x39c   :  { %v920_v38 = vsel %vm298_vm1, %v914_v28, %v916_v14 }
 0x39d   :  { %v924_v32 = vmul.f32 %v920_v38, %v1719_v34  ;;  %v918_v59 = vpop.permute.xlu0 %917 }
 0x39e   :  { %v919_v13 = vsel %vm298_vm1, %v916_v14, %v918_v59  ;;  %v922_v60 = vsel %vm298_vm1, %v918_v59, %v912_v29 }
 0x39f   :  { %v925_v61 = vmul.f32 %v919_v13, %v1722_v35  ;;  %v926_v7 = vmul.f32 %v922_v60, %v1716_v33  ;;  %966 = vmatprep.subr.mxu0 %v924_v32  ;;  %v896_v6 = vpop.permute.xlu1 %895  ;;  %v876_v60 = vmul.f32 %v2111_v49, %v1770_v17 }
 0x3a0   :  { %967 = vmatpush1.msra.mxu0 %v923_v15 }
 0x3a1   :  { %v898_v25 = vpop.permute.xlu0 %897  ;;  %1037 = vmatprep.subr.mxu1 %v926_v7 }
 0x3a2   :  { %1038 = vmatpush1.msra.mxu1 %v925_v61  ;;  %v905_v34 = vsel %vm265_vm2, %v896_v6, %v898_v25  ;;  %v878_v61 = vmul.f32 %v2119_v27, %v1782_v21 }
 0x3a3   :  { %v900_v36 = vpop.permute.xlu1 %899  ;;  %v907_v35 = vmul.f32 %v905_v34, %v1751_v53 }
 0x3a4   :  { %v904_v48 = vsel %vm265_vm2, %v898_v25, %v900_v36 }
 0x3a5   :  { %v908_v42 = vmul.f32 %v904_v48, %v1745_v51  ;;  %v902_v62 = vpop.permute.xlu0 %901 }
 0x3a6   :  { %v903_v33 = vsel %vm265_vm2, %v900_v36, %v902_v62  ;;  %v906_v43 = vsel %vm265_vm2, %v902_v62, %v896_v6 }
 0x3a7   :  { %v909_v44 = vmul.f32 %v903_v33, %v1748_v52  ;;  %v910_v45 = vmul.f32 %v906_v43, %v1742_v50  ;;  %968 = vmatprep.subr.mxu0 %v908_v42  ;;  %v880_v29 = vpop.permute.xlu1 %879 }
 0x3a8   :  { %969 = vmatpush1.msra.mxu0 %v907_v35 }
 0x3a9   :  { %v882_v28 = vpop.permute.xlu0 %881  ;;  %1039 = vmatprep.subr.mxu1 %v910_v45 }
 0x3aa   :  { %1040 = vmatpush1.msra.mxu1 %v909_v44  ;;  %v889_v51 = vsel %vm232_vm3, %v880_v29, %v882_v28 }
 0x3ab   :  { %v884_v53 = vpop.permute.xlu1 %883  ;;  %v891_v52 = vmul.f32 %v889_v51, %v1785_v22 }
 0x3ac   :  { %v888_v12 = vsel %vm232_vm3, %v882_v28, %v884_v53 }
 0x3ad   :  { %v892_v14 = vmul.f32 %v888_v12, %v1776_v19  ;;  %v886_v38 = vpop.permute.xlu0 %885  ;;  %v875_v19 = vmul.f32 %v2107_v47, %v1788_v23 }
 0x3ae   :  { %v887_v50 = vsel %vm232_vm3, %v884_v53, %v886_v38  ;;  %v890_v32 = vsel %vm232_vm3, %v886_v38, %v880_v29 }
 0x3af   :  { %v893_v59 = vmul.f32 %v887_v50, %v1779_v20  ;;  %v894_v15 = vmul.f32 %v890_v32, %v1773_v18  ;;  %970 = vmatprep.subr.mxu0 %v892_v14  ;;  %v860_v13 = vpop.permute.xlu1 %859  ;;  %v877_v18 = vmul.f32 %v2115_v2, %v1791_v24 }
 0x3b0   :  { %971 = vmatpush1.msra.mxu0 %v891_v52 }
 0x3b1   :  { %v862_v22 = vpop.permute.xlu0 %861  ;;  %972 = vmatprep.subr.mxu0 %v876_v60  ;;  %1041 = vmatprep.subr.mxu1 %v894_v15 }
 0x3b2   :  { %v869_v20 = vsel %vm179_vm4, %v860_v13, %v862_v22  ;;  %973 = vmatpush1.msra.mxu0 %v875_v19  ;;  %1042 = vmatpush1.msra.mxu1 %v893_v59 }
 0x3b3   :  { %v872_v17 = vmul.f32 %v869_v20, %v1797_v31  ;;  %1043 = vmatprep.subr.mxu1 %v878_v61  ;;  %v864_v49 = vpop.permute.xlu1 %863 }
 0x3b4   :  { %1044 = vmatpush1.msra.mxu1 %v877_v18  ;;  %v868_v23 = vsel %vm179_vm4, %v862_v22, %v864_v49 }
 0x3b5   :  { %v866_v47 = vpop.permute.xlu0 %865  ;;  %974 = vmatprep.subr.mxu0 %v872_v17  ;;  %v873_v31 = vmul.f32 %v868_v23, %v1824_v1 }
 0x3b6   :  { %v867_v21 = vsel %vm179_vm4, %v864_v49, %v866_v47  ;;  %v870_v27 = vsel %vm179_vm4, %v866_v47, %v860_v13 }
 0x3b7   :  { %v871_v7 = vmul.f32 %v870_v27, %v1820_v54  ;;  %v874_v24 = vmul.f32 %v867_v21, %v1827_v0  ;;  %v844_v2 = vpop.permute.xlu1 %843 }
 0x3b9   :  { %v846_v6 = vpop.permute.xlu0 %845  ;;  %975 = vmatpush1.msra.mxu0 %v871_v7  ;;  %1045 = vmatprep.subr.mxu1 %v874_v24 }
 0x3ba   :  { %v853_v25 = vsel %vm146_vm5, %v844_v2, %v846_v6  ;;  %1046 = vmatpush1.msra.mxu1 %v873_v31 }
 0x3bb   :  { %v856_v34 = vmul.f32 %v853_v25, %v1841_v5  ;;  %v848_v36 = vpop.permute.xlu1 %847 }
 0x3bc   :  { %v852_v48 = vsel %vm146_vm5, %v846_v6, %v848_v36 }
 0x3bd   :  { %v850_v42 = vpop.permute.xlu0 %849  ;;  %976 = vmatprep.subr.mxu0 %v856_v34  ;;  %v857_v33 = vmul.f32 %v852_v48, %v1850_v26 }
 0x3be   :  { %v851_v54 = vsel %vm146_vm5, %v848_v36, %v850_v42  ;;  %v854_v1 = vsel %vm146_vm5, %v850_v42, %v844_v2 }
 0x3bf   :  { %v855_v0 = vmul.f32 %v854_v1, %v1846_v16  ;;  %v858_v62 = vmul.f32 %v851_v54, %v1853_v30  ;;  %v828_v35 = vpop.permute.xlu1 %827 }
 0x3c1   :  { %v830_v5 = vpop.permute.xlu0 %829  ;;  %977 = vmatpush1.msra.mxu0 %v855_v0  ;;  %1047 = vmatprep.subr.mxu1 %v858_v62 }
 0x3c2   :  { %v837_v43 = vsel %vm113_vm6, %v828_v35, %v830_v5  ;;  %1048 = vmatpush1.msra.mxu1 %v857_v33 }
 0x3c3   :  { %v840_v44 = vmul.f32 %v837_v43, %v1867_v46  ;;  %v832_v45 = vpop.permute.xlu1 %831 }
 0x3c4   :  { %v836_v29 = vsel %vm113_vm6, %v830_v5, %v832_v45 }
 0x3c5   :  { %v834_v28 = vpop.permute.xlu0 %833  ;;  %978 = vmatprep.subr.mxu0 %v840_v44  ;;  %v841_v12 = vmul.f32 %v836_v29, %v1876_v55 }
 0x3c6   :  { %v835_v16 = vsel %vm113_vm6, %v832_v45, %v834_v28  ;;  %v838_v26 = vsel %vm113_vm6, %v834_v28, %v828_v35 }
 0x3c7   :  { %v839_v30 = vmul.f32 %v838_v26, %v1872_v3  ;;  %v842_v51 = vmul.f32 %v835_v16, %v1879_v56  ;;  %v812_v53 = vpop.permute.xlu1 %811 }
 0x3c9   :  { %v814_v46 = vpop.permute.xlu0 %813  ;;  %979 = vmatpush1.msra.mxu0 %v839_v30  ;;  %1049 = vmatprep.subr.mxu1 %v842_v51 }
 0x3ca   :  { %v821_v14 = vsel %vm80_vm7, %v812_v53, %v814_v46  ;;  %1050 = vmatpush1.msra.mxu1 %v841_v12 }
 0x3cb   :  { %v824_v38 = vmul.f32 %v821_v14, %v1893_v9  ;;  %v816_v52 = vpop.permute.xlu1 %815  ;;  %v1572_v9 = vmov 16  }
 0x3cc   :  { %v820_v50 = vsel %vm80_vm7, %v814_v46, %v816_v52  ;;  %1466 = vset.pattern.permute.xlu1 %v1572_v9  ;;  %1467 = vset.pattern.permute.xlu0 %v1572_v9 }
 0x3cd   :  { %v818_v32 = vpop.permute.xlu0 %817  ;;  %980 = vmatprep.subr.mxu0 %v824_v38  ;;  %v825_v15 = vmul.f32 %v820_v50, %v1902_v40  ;;  %1397 = vperm.xlu1 %1466, %v2181_v58  }
 0x3ce   :  { %v819_v3 = vsel %vm80_vm7, %v816_v52, %v818_v32  ;;  %v822_v55 = vsel %vm80_vm7, %v818_v32, %v812_v53 }
 0x3cf   :  { %v823_v56 = vmul.f32 %v822_v55, %v1899_v39  ;;  %v826_v59 = vmul.f32 %v819_v3, %v1905_v41 }
 0x3d1   :  { %981 = vmatpush1.msra.mxu0 %v823_v56  ;;  %1051 = vmatprep.subr.mxu1 %v826_v59  ;;  %v1106_v8 = vpop.permute.xlu0 %1105 }
 0x3d2   :  { %1438 = vmatmul.mubr.msk.f32.vlgmr.msra.gmra.mxu0 %vm361_vm8, %v2179_v57  ;;  %1052 = vmatpush1.msra.mxu1 %v825_v15 }
 0x3d3   :  { %1140 = vmatprep.subr.mxu0 %v1930_v10  ;;  %1439 = vmatmul.mubr.msk.f32.vlgmr.msra.gmra.mxu1 %vm361_vm8, %v2179_v57 }
 0x3d4   :  { %1141 = vmatpush1.msra.mxu0 %v1922_v63  ;;  %1211 = vmatprep.subr.mxu1 %v1936_v37 }
 0x3d5   :  { %1212 = vmatpush1.msra.mxu1 %v1924_v11  ;;  %1174 = vmatprep.mubr.f32.mxu0 %v1568_v4 }
 0x3d6   :  { %1245 = vmatprep.mubr.f32.mxu1 %v1568_v4  ;;  %1440 = vmatmul.mubr.msk.f32.vlgmr.msra.gmra.mxu0 %vm1107_vm0, %v1106_v8 }
 0x3d7   :  { %1441 = vmatmul.mubr.msk.f32.vlgmr.msra.gmra.mxu1 %vm1107_vm0, %v1106_v8  ;;  %1318 = vmatprep.mubr.f32.mxu0 %v1568_v4 }
 0x3d8   :  { %1389 = vmatprep.mubr.f32.mxu1 %v1568_v4  ;;  %v946_v39 = vpop.permute.xlu1 %945 }
 0x448   :  { %v1398_v31 = vpop.permute.xlu1 %1397 }
 0x492   :  { %v1016_v40 = vpop.f32.mrf.mxu0 }
 0x493   :  { %v1017_v41 = vadd.f32 %v1016_v40, %v946_v39  ;;  %v1087_v63 = vpop.f32.mrf.mxu1 }
 0x494   :  { %v1088_v11 = vadd.f32 %v1087_v63, %v946_v39  ;;  %v1018_v10 = vpop.f32.mrf.mxu0 }
 0x495   :  { %v1019_v37 = vadd.f32 %v1018_v10, %v946_v39  ;;  %v1089_v57 = vpop.f32.mrf.mxu1  ;;  %v1096_v13 = vmul.f32 0.01, %v1017_v41  ;;  %vm1092_vm1 = vcmp.gt.f32.partialorder %v1017_v41, 0.0 }
 0x496   :  { %v1090_v60 = vadd.f32 %v1089_v57, %v946_v39  ;;  %v1098_v19 = vmul.f32 0.01, %v1088_v11  ;;  %vm1094_vm3 = vcmp.gt.f32.partialorder %v1088_v11, 0.0  ;;  %v1176_v49 = vpop.f32.mrf.mxu0 }
 0x497   :  { %v1097_v22 = vmul.f32 0.01, %v1019_v37  ;;  %vm1093_vm2 = vcmp.gt.f32.partialorder %v1019_v37, 0.0  ;;  %v1100_v20 = vsel %vm1092_vm1, %v1017_v41, %v1096_v13  ;;  %v1247_v23 = vpop.f32.mrf.mxu1 }
 0x498   :  { %v1099_v4 = vmul.f32 0.01, %v1090_v60  ;;  %vm1095_vm4 = vcmp.gt.f32.partialorder %v1090_v60, 0.0  ;;  %v1102_v17 = vsel %vm1094_vm3, %v1088_v11, %v1098_v19  ;;  %v1178_v47 = vpop.f32.mrf.mxu0 }
 0x499   :  { %v1101_v61 = vsel %vm1093_vm2, %v1019_v37, %v1097_v22  ;;  %v1249_v21 = vpop.f32.mrf.mxu1 }
 0x49a   :  { %1284 = vmatprep.subr.mxu0 %v1101_v61  ;;  %v1103_v18 = vsel %vm1095_vm4, %v1090_v60, %v1099_v4 }
 0x49b   :  { %1285 = vmatpush1.msra.mxu0 %v1100_v20  ;;  %1355 = vmatprep.subr.mxu1 %v1103_v18 }
 0x49c   :  { %1442 = vmatmul.mubr.msk.f32.vlgmr.msra.gmra.mxu0 %vm1107_vm0, %v2181_v58  ;;  %1356 = vmatpush1.msra.mxu1 %v1102_v17 }
 0x49d   :  { %1443 = vmatmul.mubr.msk.f32.vlgmr.msra.gmra.mxu1 %vm1107_vm0, %v2181_v58 }
 0x55c   :  { %v1320_v27 = vpop.f32.mrf.mxu0 }
 0x55d   :  { %v1321_v7 = vadd.f32 %v1320_v27, %v1176_v49  ;;  %v1391_v24 = vpop.f32.mrf.mxu1 }
 0x55e   :  { %v1392_v2 = vadd.f32 %v1391_v24, %v1247_v23  ;;  %v1322_v6 = vpop.f32.mrf.mxu0 }
 0x55f   :  { %v1323_v25 = vadd.f32 %v1322_v6, %v1178_v47  ;;  %v1393_v34 = vpop.f32.mrf.mxu1  ;;  %v1400_v48 = vadd.f32 %v1398_v31, %v1321_v7 }
 0x560   :  { %v1394_v36 = vadd.f32 %v1393_v34, %v1249_v21  ;;  %v1402_v54 = vadd.f32 %v1398_v31, %v1392_v2 }
 0x561   :  { %v1401_v42 = vadd.f32 %v1398_v31, %v1323_v25 }
 0x562   :  { %v1403_v1 = vadd.f32 %v1398_v31, %v1394_v36 }
 0x563   :  { %v1408_v58 = vcombine.low %v1400_v48, %v1401_v42 }
 0x564   :  { %v1409_v0 = vcombine.low %v1402_v54, %v1403_v1 }
 0x565   :  { %1412 = vst [vmem:[#allocation8] sm:$0xff] %v1408_v58 }
 0x566   :  { %1413 = vst [vmem:[#allocation8 + $0x8] sm:$0xff] %v1409_v0 }
 0x567   :  { %1539 = shalt.err (!%p1536_p5)
}
 0x568   :  { %1423 = dma.vmem_to_hbm [thread:$0]  %s1421_s11, 256, %s2314_s3, [#allocation4]  }
 0x569   :  { %1552 = dma.done.wait [#allocation4], 256  }
 0x56a   :  { %1553 = vsyncadd [#allocation4], 4294967040 }
 0x56b   :  { %1427 = vsyncpa [#allocation3], 1 }
 0x56c   :  { %1428 = vsyncpa [#allocation6], 1 }
 0x56d   :  { %1429 = vsyncpa [#allocation4], 1 }

</bundles_post_ra>
